<compile_context>
chip_gen: v6e
topology: v6e:2x2x1
jax: 0.10.0
libtpu: 0.0.40
codegen_flags: <defaults>
</compile_context>

<pallas_src>
import jax
import jax.numpy as jnp
from jax.experimental import pallas as pl
from jax.experimental.pallas import tpu as pltpu

LANE = 128
SUBLANE = 8


def mlp_kernel(x_ref, w1_ref, b1_ref, w2_ref, b2_ref, w3_ref, b3_ref,
               w4_ref, b4_ref, o_ref):
    cdt = w1_ref.dtype  # matmul-input dtype (bf16 or f32); accumulation is f32

    def layer(a, w_ref, b_ref, relu):
        h = jnp.dot(a, w_ref[...], preferred_element_type=jnp.float32)  # MXU
        h = h + b_ref[...]            # f32 bias-add (VPU)
        if relu:
            h = jnp.maximum(h, 0.0)   # f32 ReLU (VPU)
        return h

    h = layer(x_ref[...], w1_ref, b1_ref, relu=True)
    # dropout (inference) = identity
    h = layer(h.astype(cdt), w2_ref, b2_ref, relu=True)
    # dropout (inference) = identity
    h = layer(h.astype(cdt), w3_ref, b3_ref, relu=True)
    out = layer(h.astype(cdt), w4_ref, b4_ref, relu=False)
    o_ref[...] = out.astype(o_ref.dtype)


def _round_up(n, m):
    return ((n + m - 1) // m) * m


def _pad2d(a, rows, cols):
    pr, pc = rows - a.shape[0], cols - a.shape[1]
    if pr == 0 and pc == 0:
        return a
    return jnp.pad(a, ((0, pr), (0, pc)))


def _num_tensorcores():
    """Best-effort: 2 for megacore chips (v4 / v5p / v7x), 1 otherwise."""
    try:
        kind = jax.devices()[0].device_kind.lower()
    except Exception:
        return 1
    if ("v7" in kind) or ("v4" in kind) or ("v5p" in kind):
        return 2
    return 1


def _pick_batch_tile(B, Dp, Hmax, Cp, num_tc, vmem_budget=12 * 2**20):
    """Biggest batch tile fitting the VMEM budget; split only for megacore."""
    Bp8 = _round_up(max(B, SUBLANE), SUBLANE)
    # Bytes per batch row resident in VMEM: x (bf16, double-buffered),
    # out (f32, double-buffered), ~2 live f32 activations of the widest layer.
    per_row = 2 * Dp * 2 + 2 * Cp * 4 + 2 * Hmax * 4
    cap = (vmem_budget // max(per_row, 1)) // SUBLANE * SUBLANE
    cap = max(SUBLANE, min(2048, cap))
    tile = min(Bp8, cap)
    if num_tc > 1 and Bp8 > SUBLANE:
        # Give each TensorCore at least one grid step (batch axis is "parallel").
        tile = min(tile, _round_up(pl.cdiv(Bp8, num_tc), SUBLANE))
    return max(SUBLANE, (tile // SUBLANE) * SUBLANE)


class NeuralNetAdvancePallas:
    """Fused 4-layer MLP forward. Params are padded/cast once at construction."""

    def __init__(self, params, *, use_bf16=True, out_dtype=jnp.float32):
        (w1, b1), (w2, b2), (w3, b3), (w4, b4) = params
        self.in_features = w1.shape[0]
        self.num_classes = w4.shape[1]
        self.out_dtype = jnp.dtype(out_dtype)
        self.cdt = jnp.bfloat16 if use_bf16 else jnp.float32

        # Lane-pad every feature axis to a multiple of 128 (dense MXU tiles,
        # lane-dense output writeback). Zero padding is numerically exact.
        self.Dp = _round_up(self.in_features, LANE)
        self.H1p = _round_up(w1.shape[1], LANE)
        self.H2p = _round_up(w2.shape[1], LANE)
        self.H3p = _round_up(w3.shape[1], LANE)
        self.Cp = _round_up(self.num_classes, LANE)

        # One-time param prep (hoisted out of the per-call path).
        self._params = (
            _pad2d(w1, self.Dp, self.H1p).astype(self.cdt),
            _pad2d(b1, 1, self.H1p).astype(jnp.float32),
            _pad2d(w2, self.H1p, self.H2p).astype(self.cdt),
            _pad2d(b2, 1, self.H2p).astype(jnp.float32),
            _pad2d(w3, self.H2p, self.H3p).astype(self.cdt),
            _pad2d(b3, 1, self.H3p).astype(jnp.float32),
            _pad2d(w4, self.H3p, self.Cp).astype(self.cdt),
            _pad2d(b4, 1, self.Cp).astype(jnp.float32),
        )

        self._num_tc = _num_tensorcores()
        self._fwd = None  # resolved on first call (Buffered(1) capability probe)

    # ------------------------------------------------------------------
    def _make_forward(self, single_buffer_weights):
        Dp, H1p, H2p, H3p, Cp = self.Dp, self.H1p, self.H2p, self.H3p, self.Cp
        Hmax = max(H1p, H2p, H3p, Cp)
        cdt, out_dtype, num_tc = self.cdt, self.out_dtype, self._num_tc
        cdt_bytes = jnp.dtype(cdt).itemsize
        out_bytes = out_dtype.itemsize
        C = self.num_classes

        @jax.jit
        def fwd(x, w1p, b1p, w2p, b2p, w3p, b3p, w4p, b4p):
            B = x.shape[0]
            tile = _pick_batch_tile(B, Dp, Hmax, Cp, num_tc)
            Bp = _round_up(max(B, tile), tile)

            # x pad + cast fuses under this jit with the custom call.
            xp = _pad2d(x, Bp, Dp).astype(cdt)

            def fixed(arr):
                # Whole-array block, constant index map across the grid.
                if single_buffer_weights:
                    # Never re-fetched -> single-buffer to halve VMEM footprint.
                    return pl.BlockSpec(arr.shape, lambda i: (0, 0),
                                        pipeline_mode=pl.Buffered(1))
                return pl.BlockSpec(arr.shape, lambda i: (0, 0))

            wbuf = 1 if single_buffer_weights else 2
            weight_bytes = sum(a.size * a.dtype.itemsize
                               for a in (w1p, b1p, w2p, b2p, w3p, b3p, w4p, b4p))
            vmem_plan = (2 * tile * Dp * cdt_bytes       # x, double-buffered
                         + 2 * tile * Cp * out_bytes     # out, double-buffered
                         + wbuf * weight_bytes           # resident weights/biases
                         + 4 * tile * Hmax * 4)          # live f32 activations
            vmem_limit = int(min(max(2 * vmem_plan, 8 * 2**20), 64 * 2**20))

            flops = 2 * Bp * (Dp * H1p + H1p * H2p + H2p * H3p + H3p * Cp)
            bytes_accessed = (xp.size * cdt_bytes
                              + Bp * Cp * out_bytes
                              + weight_bytes)

            out_padded = pl.pallas_call(
                mlp_kernel,
                out_shape=jax.ShapeDtypeStruct((Bp, Cp), out_dtype),
                grid_spec=pltpu.PrefetchScalarGridSpec(
                    num_scalar_prefetch=0,
                    grid=(Bp // tile,),
                    in_specs=[
                        pl.BlockSpec((tile, Dp), lambda i: (i, 0)),
                        fixed(w1p), fixed(b1p),
                        fixed(w2p), fixed(b2p),
                        fixed(w3p), fixed(b3p),
                        fixed(w4p), fixed(b4p),
                    ],
                    out_specs=pl.BlockSpec((tile, Cp), lambda i: (i, 0)),
                ),
                compiler_params=pltpu.CompilerParams(
                    dimension_semantics=("parallel",),
                    vmem_limit_bytes=vmem_limit),
                cost_estimate=pl.CostEstimate(
                    flops=flops, transcendentals=0,
                    bytes_accessed=bytes_accessed),
            )(xp, w1p, b1p, w2p, b2p, w3p, b3p, w4p, b4p)

            # Output slice fuses under the same jit.
            return out_padded[:B, :C]

        return fwd

    # ------------------------------------------------------------------
    def __call__(self, x):
        args = (x,) + self._params
        if self._fwd is None:
            last_err = None
            # Prefer single-buffered constant weights (pl.Buffered(1)); fall
            # back to default buffering if this JAX/Mosaic rejects it.
            for single_buffer in (True, False):
                fwd = self._make_forward(single_buffer)
                try:
                    out = jax.block_until_ready(fwd(*args))
                except Exception as e:  # lowering/compile failure -> fallback
                    last_err = e
                    continue
                self._fwd = fwd
                return out
            raise last_err
        return self._fwd(*args)


def init_linear(key, in_features, out_features):
    """Deterministic init mimicking nn.Linear's uniform(-1/sqrt(in), 1/sqrt(in))."""
    kw, kb = jax.random.split(key)
    bound = 1.0 / jnp.sqrt(jnp.float32(in_features))
    w = jax.random.uniform(kw, (in_features, out_features), jnp.float32,
                           minval=-bound, maxval=bound)
    b = jax.random.uniform(kb, (1, out_features), jnp.float32,
                           minval=-bound, maxval=bound)
    return w, b


if __name__ == "__main__":
    # Shapes consistent with the module's __init__ signature.
    input_size, hidden1, hidden2, hidden3, num_classes = 32, 64, 64, 32, 8
    batch = 256  # exercises the large-tile / 1-step (or 2-step megacore) grid

    key = jax.random.PRNGKey(0)
    k_x, k1, k2, k3, k4 = jax.random.split(key, 5)

    x = jax.random.normal(k_x, (batch, input_size), jnp.float32)
    params = (
        init_linear(k1, input_size, hidden1),
        init_linear(k2, hidden1, hidden2),
        init_linear(k3, hidden2, hidden3),
        init_linear(k4, hidden3, num_classes),
    )

    model = NeuralNetAdvancePallas(params, use_bf16=True)
    out = jax.block_until_ready(model(x))

    # Pure-JAX reference with the same bf16 quantization points (f32 accum),
    # so the comparison stays tight. Dropout is identity at inference.
    def ref_fwd(x, params):
        def lin(a, w, b):
            return jnp.dot(a.astype(jnp.bfloat16), w.astype(jnp.bfloat16),
                           preferred_element_type=jnp.float32) + b

        (w1, b1), (w2, b2), (w3, b3), (w4, b4) = params
        h = jnp.maximum(lin(x, w1, b1), 0.0)
        h = jnp.maximum(lin(h, w2, b2), 0.0)
        h = jnp.maximum(lin(h, w3, b3), 0.0)
        return lin(h, w4, b4)

    ref = ref_fwd(x, params)
    assert out.shape == (batch, num_classes)
    assert jnp.allclose(out, ref, atol=2e-3, rtol=2e-3), (
        float(jnp.max(jnp.abs(out - ref))))

    print("KERNEL_OK")
</pallas_src>

<mosaic_0001>
module attributes {stable_mosaic.version = 11 : i64} {
  func.func @mlp_kernel(%arg0: i32, %arg1: memref<256x128xbf16, #tpu.memory_space<vmem>>, %arg2: memref<128x128xbf16, #tpu.memory_space<vmem>>, %arg3: memref<1x128xf32, #tpu.memory_space<vmem>>, %arg4: memref<128x128xbf16, #tpu.memory_space<vmem>>, %arg5: memref<1x128xf32, #tpu.memory_space<vmem>>, %arg6: memref<128x128xbf16, #tpu.memory_space<vmem>>, %arg7: memref<1x128xf32, #tpu.memory_space<vmem>>, %arg8: memref<128x128xbf16, #tpu.memory_space<vmem>>, %arg9: memref<1x128xf32, #tpu.memory_space<vmem>>, %arg10: memref<256x128xf32, #tpu.memory_space<vmem>>) attributes {dimension_semantics = [#tpu.dimension_semantics<parallel>], iteration_bounds = array<i64: 1>, scalar_prefetch = 0 : i64, scratch_operands = 0 : i64, tpu.core_type = #tpu.core_type<tc>, window_params = [{transform_indices = @transform_0, window_bounds = array<i64: 256, 128>}, {pipeline_mode = #tpu.pipeline_mode<synchronous>, transform_indices = @transform_1, window_bounds = array<i64: 128, 128>}, {pipeline_mode = #tpu.pipeline_mode<synchronous>, transform_indices = @transform_2, window_bounds = array<i64: 1, 128>}, {pipeline_mode = #tpu.pipeline_mode<synchronous>, transform_indices = @transform_3, window_bounds = array<i64: 128, 128>}, {pipeline_mode = #tpu.pipeline_mode<synchronous>, transform_indices = @transform_4, window_bounds = array<i64: 1, 128>}, {pipeline_mode = #tpu.pipeline_mode<synchronous>, transform_indices = @transform_5, window_bounds = array<i64: 128, 128>}, {pipeline_mode = #tpu.pipeline_mode<synchronous>, transform_indices = @transform_6, window_bounds = array<i64: 1, 128>}, {pipeline_mode = #tpu.pipeline_mode<synchronous>, transform_indices = @transform_7, window_bounds = array<i64: 128, 128>}, {pipeline_mode = #tpu.pipeline_mode<synchronous>, transform_indices = @transform_8, window_bounds = array<i64: 1, 128>}, {transform_indices = @transform_9, window_bounds = array<i64: 256, 128>}]} {
    %c0 = arith.constant 0 : index
    %c0_0 = arith.constant 0 : index
    %0 = vector.load %arg1[%c0, %c0_0] : memref<256x128xbf16, #tpu.memory_space<vmem>>, vector<256x128xbf16>
    %c0_1 = arith.constant 0 : index
    %c0_2 = arith.constant 0 : index
    %1 = vector.load %arg2[%c0_1, %c0_2] : memref<128x128xbf16, #tpu.memory_space<vmem>>, vector<128x128xbf16>
    %cst = arith.constant dense<0.000000e+00> : vector<256x128xf32>
    %2 = tpu.matmul %0, %1, %cst {dimension_numbers = #tpu.dot_dimension_numbers<[1], [0], [0], [1], [0, 0, 1, 1], [], []>} : vector<256x128xbf16>, vector<128x128xbf16>, vector<256x128xf32> -> vector<256x128xf32>
    %c0_3 = arith.constant 0 : index
    %c0_4 = arith.constant 0 : index
    %3 = vector.load %arg3[%c0_3, %c0_4] : memref<1x128xf32, #tpu.memory_space<vmem>>, vector<1x128xf32>
    %4 = vector.broadcast %3 : vector<1x128xf32> to vector<256x128xf32>
    %5 = arith.addf %2, %4 : vector<256x128xf32>
    %cst_5 = arith.constant 0.000000e+00 : f32
    %6 = vector.broadcast %cst_5 : f32 to vector<256x128xf32>
    %7 = arith.maximumf %5, %6 : vector<256x128xf32>
    %8 = arith.truncf %7 : vector<256x128xf32> to vector<256x128xbf16>
    %c0_6 = arith.constant 0 : index
    %c0_7 = arith.constant 0 : index
    %9 = vector.load %arg4[%c0_6, %c0_7] : memref<128x128xbf16, #tpu.memory_space<vmem>>, vector<128x128xbf16>
    %cst_8 = arith.constant dense<0.000000e+00> : vector<256x128xf32>
    %10 = tpu.matmul %8, %9, %cst_8 {dimension_numbers = #tpu.dot_dimension_numbers<[1], [0], [0], [1], [0, 0, 1, 1], [], []>} : vector<256x128xbf16>, vector<128x128xbf16>, vector<256x128xf32> -> vector<256x128xf32>
    %c0_9 = arith.constant 0 : index
    %c0_10 = arith.constant 0 : index
    %11 = vector.load %arg5[%c0_9, %c0_10] : memref<1x128xf32, #tpu.memory_space<vmem>>, vector<1x128xf32>
    %12 = vector.broadcast %11 : vector<1x128xf32> to vector<256x128xf32>
    %13 = arith.addf %10, %12 : vector<256x128xf32>
    %cst_11 = arith.constant 0.000000e+00 : f32
    %14 = vector.broadcast %cst_11 : f32 to vector<256x128xf32>
    %15 = arith.maximumf %13, %14 : vector<256x128xf32>
    %16 = arith.truncf %15 : vector<256x128xf32> to vector<256x128xbf16>
    %c0_12 = arith.constant 0 : index
    %c0_13 = arith.constant 0 : index
    %17 = vector.load %arg6[%c0_12, %c0_13] : memref<128x128xbf16, #tpu.memory_space<vmem>>, vector<128x128xbf16>
    %cst_14 = arith.constant dense<0.000000e+00> : vector<256x128xf32>
    %18 = tpu.matmul %16, %17, %cst_14 {dimension_numbers = #tpu.dot_dimension_numbers<[1], [0], [0], [1], [0, 0, 1, 1], [], []>} : vector<256x128xbf16>, vector<128x128xbf16>, vector<256x128xf32> -> vector<256x128xf32>
    %c0_15 = arith.constant 0 : index
    %c0_16 = arith.constant 0 : index
    %19 = vector.load %arg7[%c0_15, %c0_16] : memref<1x128xf32, #tpu.memory_space<vmem>>, vector<1x128xf32>
    %20 = vector.broadcast %19 : vector<1x128xf32> to vector<256x128xf32>
    %21 = arith.addf %18, %20 : vector<256x128xf32>
    %cst_17 = arith.constant 0.000000e+00 : f32
    %22 = vector.broadcast %cst_17 : f32 to vector<256x128xf32>
    %23 = arith.maximumf %21, %22 : vector<256x128xf32>
    %24 = arith.truncf %23 : vector<256x128xf32> to vector<256x128xbf16>
    %c0_18 = arith.constant 0 : index
    %c0_19 = arith.constant 0 : index
    %25 = vector.load %arg8[%c0_18, %c0_19] : memref<128x128xbf16, #tpu.memory_space<vmem>>, vector<128x128xbf16>
    %cst_20 = arith.constant dense<0.000000e+00> : vector<256x128xf32>
    %26 = tpu.matmul %24, %25, %cst_20 {dimension_numbers = #tpu.dot_dimension_numbers<[1], [0], [0], [1], [0, 0, 1, 1], [], []>} : vector<256x128xbf16>, vector<128x128xbf16>, vector<256x128xf32> -> vector<256x128xf32>
    %c0_21 = arith.constant 0 : index
    %c0_22 = arith.constant 0 : index
    %27 = vector.load %arg9[%c0_21, %c0_22] : memref<1x128xf32, #tpu.memory_space<vmem>>, vector<1x128xf32>
    %28 = vector.broadcast %27 : vector<1x128xf32> to vector<256x128xf32>
    %29 = arith.addf %26, %28 : vector<256x128xf32>
    %c0_23 = arith.constant 0 : index
    %c0_24 = arith.constant 0 : index
    %30 = vector.load %arg10[%c0_23, %c0_24] : memref<256x128xf32, #tpu.memory_space<vmem>>, vector<256x128xf32>
    tpu.vector_store %arg10[%c0_23, %c0_24], %29 {strides = array<i32>} : memref<256x128xf32, #tpu.memory_space<vmem>>, vector<256x128xf32>,
    return
  }
  func.func @transform_0(%arg0: i32) -> (i32, i32) {
    %c0_i32 = arith.constant 0 : i32
    %c0_i32_0 = arith.constant 0 : i32
    return %arg0, %c0_i32 : i32, i32
  }
  func.func @transform_1(%arg0: i32) -> (i32, i32) {
    %c0_i32 = arith.constant 0 : i32
    %c0_i32_0 = arith.constant 0 : i32
    %c0_i32_1 = arith.constant 0 : i32
    return %c0_i32, %c0_i32_0 : i32, i32
  }
  func.func @transform_2(%arg0: i32) -> (i32, i32) {
    %c0_i32 = arith.constant 0 : i32
    %c0_i32_0 = arith.constant 0 : i32
    %c0_i32_1 = arith.constant 0 : i32
    return %c0_i32, %c0_i32_0 : i32, i32
  }
  func.func @transform_3(%arg0: i32) -> (i32, i32) {
    %c0_i32 = arith.constant 0 : i32
    %c0_i32_0 = arith.constant 0 : i32
    %c0_i32_1 = arith.constant 0 : i32
    return %c0_i32, %c0_i32_0 : i32, i32
  }
  func.func @transform_4(%arg0: i32) -> (i32, i32) {
    %c0_i32 = arith.constant 0 : i32
    %c0_i32_0 = arith.constant 0 : i32
    %c0_i32_1 = arith.constant 0 : i32
    return %c0_i32, %c0_i32_0 : i32, i32
  }
  func.func @transform_5(%arg0: i32) -> (i32, i32) {
    %c0_i32 = arith.constant 0 : i32
    %c0_i32_0 = arith.constant 0 : i32
    %c0_i32_1 = arith.constant 0 : i32
    return %c0_i32, %c0_i32_0 : i32, i32
  }
  func.func @transform_6(%arg0: i32) -> (i32, i32) {
    %c0_i32 = arith.constant 0 : i32
    %c0_i32_0 = arith.constant 0 : i32
    %c0_i32_1 = arith.constant 0 : i32
    return %c0_i32, %c0_i32_0 : i32, i32
  }
  func.func @transform_7(%arg0: i32) -> (i32, i32) {
    %c0_i32 = arith.constant 0 : i32
    %c0_i32_0 = arith.constant 0 : i32
    %c0_i32_1 = arith.constant 0 : i32
    return %c0_i32, %c0_i32_0 : i32, i32
  }
  func.func @transform_8(%arg0: i32) -> (i32, i32) {
    %c0_i32 = arith.constant 0 : i32
    %c0_i32_0 = arith.constant 0 : i32
    %c0_i32_1 = arith.constant 0 : i32
    return %c0_i32, %c0_i32_0 : i32, i32
  }
  func.func @transform_9(%arg0: i32) -> (i32, i32) {
    %c0_i32 = arith.constant 0 : i32
    %c0_i32_0 = arith.constant 0 : i32
    return %arg0, %c0_i32 : i32, i32
  }
}

module attributes {stable_mosaic.version = 11 : i64} {
  func.func @mlp_kernel(%arg0: i32, %arg1: memref<256x128xbf16, #tpu.memory_space<vmem>>, %arg2: memref<128x128xbf16, #tpu.memory_space<vmem>>, %arg3: memref<1x128xf32, #tpu.memory_space<vmem>>, %arg4: memref<128x128xbf16, #tpu.memory_space<vmem>>, %arg5: memref<1x128xf32, #tpu.memory_space<vmem>>, %arg6: memref<128x128xbf16, #tpu.memory_space<vmem>>, %arg7: memref<1x128xf32, #tpu.memory_space<vmem>>, %arg8: memref<128x128xbf16, #tpu.memory_space<vmem>>, %arg9: memref<1x128xf32, #tpu.memory_space<vmem>>, %arg10: memref<256x128xf32, #tpu.memory_space<vmem>>) attributes {dimension_semantics = [#tpu.dimension_semantics<parallel>], iteration_bounds = array<i64: 1>, scalar_prefetch = 0 : i64, scratch_operands = 0 : i64, tpu.core_type = #tpu.core_type<tc>, window_params = [{transform_indices = @transform_0, window_bounds = array<i64: 256, 128>}, {pipeline_mode = #tpu.pipeline_mode<synchronous>, transform_indices = @transform_1, window_bounds = array<i64: 128, 128>}, {pipeline_mode = #tpu.pipeline_mode<synchronous>, transform_indices = @transform_2, window_bounds = array<i64: 1, 128>}, {pipeline_mode = #tpu.pipeline_mode<synchronous>, transform_indices = @transform_3, window_bounds = array<i64: 128, 128>}, {pipeline_mode = #tpu.pipeline_mode<synchronous>, transform_indices = @transform_4, window_bounds = array<i64: 1, 128>}, {pipeline_mode = #tpu.pipeline_mode<synchronous>, transform_indices = @transform_5, window_bounds = array<i64: 128, 128>}, {pipeline_mode = #tpu.pipeline_mode<synchronous>, transform_indices = @transform_6, window_bounds = array<i64: 1, 128>}, {pipeline_mode = #tpu.pipeline_mode<synchronous>, transform_indices = @transform_7, window_bounds = array<i64: 128, 128>}, {pipeline_mode = #tpu.pipeline_mode<synchronous>, transform_indices = @transform_8, window_bounds = array<i64: 1, 128>}, {transform_indices = @transform_9, window_bounds = array<i64: 256, 128>}]} {
    %c0 = arith.constant 0 : index
    %c0_0 = arith.constant 0 : index
    %0 = vector.load %arg1[%c0, %c0_0] : memref<256x128xbf16, #tpu.memory_space<vmem>>, vector<256x128xbf16>
    %c0_1 = arith.constant 0 : index
    %c0_2 = arith.constant 0 : index
    %1 = vector.load %arg2[%c0_1, %c0_2] : memref<128x128xbf16, #tpu.memory_space<vmem>>, vector<128x128xbf16>
    %cst = arith.constant dense<0.000000e+00> : vector<256x128xf32>
    %2 = tpu.matmul %0, %1, %cst {dimension_numbers = #tpu.dot_dimension_numbers<[1], [0], [0], [1], [0, 0, 1, 1], [], []>} : vector<256x128xbf16>, vector<128x128xbf16>, vector<256x128xf32> -> vector<256x128xf32>
    %c0_3 = arith.constant 0 : index
    %c0_4 = arith.constant 0 : index
    %3 = vector.load %arg3[%c0_3, %c0_4] : memref<1x128xf32, #tpu.memory_space<vmem>>, vector<1x128xf32>
    %4 = vector.broadcast %3 : vector<1x128xf32> to vector<256x128xf32>
    %5 = arith.addf %2, %4 : vector<256x128xf32>
    %cst_5 = arith.constant 0.000000e+00 : f32
    %6 = vector.broadcast %cst_5 : f32 to vector<256x128xf32>
    %7 = arith.maximumf %5, %6 : vector<256x128xf32>
    %8 = arith.truncf %7 : vector<256x128xf32> to vector<256x128xbf16>
    %c0_6 = arith.constant 0 : index
    %c0_7 = arith.constant 0 : index
    %9 = vector.load %arg4[%c0_6, %c0_7] : memref<128x128xbf16, #tpu.memory_space<vmem>>, vector<128x128xbf16>
    %cst_8 = arith.constant dense<0.000000e+00> : vector<256x128xf32>
    %10 = tpu.matmul %8, %9, %cst_8 {dimension_numbers = #tpu.dot_dimension_numbers<[1], [0], [0], [1], [0, 0, 1, 1], [], []>} : vector<256x128xbf16>, vector<128x128xbf16>, vector<256x128xf32> -> vector<256x128xf32>
    %c0_9 = arith.constant 0 : index
    %c0_10 = arith.constant 0 : index
    %11 = vector.load %arg5[%c0_9, %c0_10] : memref<1x128xf32, #tpu.memory_space<vmem>>, vector<1x128xf32>
    %12 = vector.broadcast %11 : vector<1x128xf32> to vector<256x128xf32>
    %13 = arith.addf %10, %12 : vector<256x128xf32>
    %cst_11 = arith.constant 0.000000e+00 : f32
    %14 = vector.broadcast %cst_11 : f32 to vector<256x128xf32>
    %15 = arith.maximumf %13, %14 : vector<256x128xf32>
    %16 = arith.truncf %15 : vector<256x128xf32> to vector<256x128xbf16>
    %c0_12 = arith.constant 0 : index
    %c0_13 = arith.constant 0 : index
    %17 = vector.load %arg6[%c0_12, %c0_13] : memref<128x128xbf16, #tpu.memory_space<vmem>>, vector<128x128xbf16>
    %cst_14 = arith.constant dense<0.000000e+00> : vector<256x128xf32>
    %18 = tpu.matmul %16, %17, %cst_14 {dimension_numbers = #tpu.dot_dimension_numbers<[1], [0], [0], [1], [0, 0, 1, 1], [], []>} : vector<256x128xbf16>, vector<128x128xbf16>, vector<256x128xf32> -> vector<256x128xf32>
    %c0_15 = arith.constant 0 : index
    %c0_16 = arith.constant 0 : index
    %19 = vector.load %arg7[%c0_15, %c0_16] : memref<1x128xf32, #tpu.memory_space<vmem>>, vector<1x128xf32>
    %20 = vector.broadcast %19 : vector<1x128xf32> to vector<256x128xf32>
    %21 = arith.addf %18, %20 : vector<256x128xf32>
    %cst_17 = arith.constant 0.000000e+00 : f32
    %22 = vector.broadcast %cst_17 : f32 to vector<256x128xf32>
    %23 = arith.maximumf %21, %22 : vector<256x128xf32>
    %24 = arith.truncf %23 : vector<256x128xf32> to vector<256x128xbf16>
    %c0_18 = arith.constant 0 : index
    %c0_19 = arith.constant 0 : index
    %25 = vector.load %arg8[%c0_18, %c0_19] : memref<128x128xbf16, #tpu.memory_space<vmem>>, vector<128x128xbf16>
    %cst_20 = arith.constant dense<0.000000e+00> : vector<256x128xf32>
    %26 = tpu.matmul %24, %25, %cst_20 {dimension_numbers = #tpu.dot_dimension_numbers<[1], [0], [0], [1], [0, 0, 1, 1], [], []>} : vector<256x128xbf16>, vector<128x128xbf16>, vector<256x128xf32> -> vector<256x128xf32>
    %c0_21 = arith.constant 0 : index
    %c0_22 = arith.constant 0 : index
    %27 = vector.load %arg9[%c0_21, %c0_22] : memref<1x128xf32, #tpu.memory_space<vmem>>, vector<1x128xf32>
    %28 = vector.broadcast %27 : vector<1x128xf32> to vector<256x128xf32>
    %29 = arith.addf %26, %28 : vector<256x128xf32>
    %c0_23 = arith.constant 0 : index
    %c0_24 = arith.constant 0 : index
    %30 = vector.load %arg10[%c0_23, %c0_24] : memref<256x128xf32, #tpu.memory_space<vmem>>, vector<256x128xf32>
    tpu.vector_store %arg10[%c0_23, %c0_24], %29 {strides = array<i32>} : memref<256x128xf32, #tpu.memory_space<vmem>>, vector<256x128xf32>,
    return
  }
  func.func @transform_0(%arg0: i32) -> (i32, i32) {
    %c0_i32 = arith.constant 0 : i32
    %c0_i32_0 = arith.constant 0 : i32
    return %arg0, %c0_i32 : i32, i32
  }
  func.func @transform_1(%arg0: i32) -> (i32, i32) {
    %c0_i32 = arith.constant 0 : i32
    %c0_i32_0 = arith.constant 0 : i32
    %c0_i32_1 = arith.constant 0 : i32
    return %c0_i32, %c0_i32_0 : i32, i32
  }
  func.func @transform_2(%arg0: i32) -> (i32, i32) {
    %c0_i32 = arith.constant 0 : i32
    %c0_i32_0 = arith.constant 0 : i32
    %c0_i32_1 = arith.constant 0 : i32
    return %c0_i32, %c0_i32_0 : i32, i32
  }
  func.func @transform_3(%arg0: i32) -> (i32, i32) {
    %c0_i32 = arith.constant 0 : i32
    %c0_i32_0 = arith.constant 0 : i32
    %c0_i32_1 = arith.constant 0 : i32
    return %c0_i32, %c0_i32_0 : i32, i32
  }
  func.func @transform_4(%arg0: i32) -> (i32, i32) {
    %c0_i32 = arith.constant 0 : i32
    %c0_i32_0 = arith.constant 0 : i32
    %c0_i32_1 = arith.constant 0 : i32
    return %c0_i32, %c0_i32_0 : i32, i32
  }
  func.func @transform_5(%arg0: i32) -> (i32, i32) {
    %c0_i32 = arith.constant 0 : i32
    %c0_i32_0 = arith.constant 0 : i32
    %c0_i32_1 = arith.constant 0 : i32
    return %c0_i32, %c0_i32_0 : i32, i32
  }
  func.func @transform_6(%arg0: i32) -> (i32, i32) {
    %c0_i32 = arith.constant 0 : i32
    %c0_i32_0 = arith.constant 0 : i32
    %c0_i32_1 = arith.constant 0 : i32
    return %c0_i32, %c0_i32_0 : i32, i32
  }
  func.func @transform_7(%arg0: i32) -> (i32, i32) {
    %c0_i32 = arith.constant 0 : i32
    %c0_i32_0 = arith.constant 0 : i32
    %c0_i32_1 = arith.constant 0 : i32
    return %c0_i32, %c0_i32_0 : i32, i32
  }
  func.func @transform_8(%arg0: i32) -> (i32, i32) {
    %c0_i32 = arith.constant 0 : i32
    %c0_i32_0 = arith.constant 0 : i32
    %c0_i32_1 = arith.constant 0 : i32
    return %c0_i32, %c0_i32_0 : i32, i32
  }
  func.func @transform_9(%arg0: i32) -> (i32, i32) {
    %c0_i32 = arith.constant 0 : i32
    %c0_i32_0 = arith.constant 0 : i32
    return %arg0, %c0_i32 : i32, i32
  }
}

</mosaic_0001>

<bundles_post_ra>
// kernel: fwd.1
= control target key start
LH: loop header
LB: loop body
LE: loop exit
PB: predicated region body
PF: predicated region fallthrough
CT: control target
= control target key end

     0   :  { %s2095_s1 = inlined_call_operand.vmem [shape: bf16[128,128], index: 1, kind: input, shape index: {}]   ;;  %s2096_s0 = inlined_call_operand.vmem [shape: bf16[256,128], index: 0, kind: input, shape index: {}]   ;;  %s2097_s3 = inlined_call_operand.vmem [shape: bf16[128,128], index: 3, kind: input, shape index: {}]   ;;  %s2098_s5 = inlined_call_operand.vmem [shape: bf16[128,128], index: 5, kind: input, shape index: {}]   ;;  %s2099_s2 = inlined_call_operand.vmem [shape: f32[1,128], index: 2, kind: input, shape index: {}]   ;;  %s2100_s7 = inlined_call_operand.vmem [shape: bf16[128,128], index: 7, kind: input, shape index: {}]   ;;  %s2101_s4 = inlined_call_operand.vmem [shape: f32[1,128], index: 4, kind: input, shape index: {}]   ;;  %s2102_s6 = inlined_call_operand.vmem [shape: f32[1,128], index: 6, kind: input, shape index: {}]   ;;  %s2103_s8 = inlined_call_operand.vmem [shape: f32[1,128], index: 8, kind: input, shape index: {}]   ;;  %s2104_s9 = inlined_call_operand.vmem [shape: f32[256,128], index: 9, kind: output, shape index: {}]  }
   0x1   :  { %v1609_v0 = vld [vmem:[%s2095_s1 + $0x38] sm:$0xff]   ;;  %v1610_v1 = vld [vmem:[%s2095_s1 + $0x30] sm:$0xff]   ;;  %v1611_v2 = vld [vmem:[%s2095_s1 + $0x28] sm:$0xff]  }
   0x2   :  { %1417 = vmatprep.subr.bf16.mxu0 %v1609_v0  ;;  %v1612_v3 = vld [vmem:[%s2095_s1 + $0x20] sm:$0xff]   ;;  %v1613_v5 = vld [vmem:[%s2095_s1 + $0x18] sm:$0xff]   ;;  %v1614_v6 = vld [vmem:[%s2095_s1 + $0x10] sm:$0xff]  }
   0x3   :  { %1418 = vmatpush3.bf16.msra.mxu0 %v1609_v0  ;;  %v1617_v4 = vld [vmem:[%s2096_s0] sm:$0xff]   ;;  %v1615_v7 = vld [vmem:[%s2095_s1 + $0x8] sm:$0xff]   ;;  %v1633_v9 = vld [vmem:[%s2097_s3 + $0x38] sm:$0xff]  }
   0x4   :  { %1419 = vmatprep.subr.bf16.mxu0 %v1610_v1  ;;  %1433 = vmatprep.mubr.bf16.mxu0 %v1617_v4  ;;  %v1616_v8 = vld [vmem:[%s2095_s1] sm:$0xff]   ;;  %v1634_v10 = vld [vmem:[%s2097_s3 + $0x30] sm:$0xff]   ;;  %v1618_v11 = vld [vmem:[%s2096_s0 + $0x8] sm:$0xff]  }
   0x5   :  { %1465 = vmatprep.subr.bf16.mxu1 %v1633_v9  ;;  %v1635_v12 = vld [vmem:[%s2097_s3 + $0x28] sm:$0xff]   ;;  %v1619_v13 = vld [vmem:[%s2096_s0 + $0x10] sm:$0xff]   ;;  %v1636_v14 = vld [vmem:[%s2097_s3 + $0x20] sm:$0xff]  }
   0x6   :  { %1466 = vmatpush3.bf16.msra.mxu1 %v1633_v9  ;;  %v1637_v15 = vld [vmem:[%s2097_s3 + $0x18] sm:$0xff]   ;;  %v1621_v17 = vld [vmem:[%s2096_s0 + $0x20] sm:$0xff]   ;;  %v1622_v18 = vld [vmem:[%s2096_s0 + $0x28] sm:$0xff]  }
   0x7   :  { %1420 = vmatpush3.bf16.msra.mxu0 %v1610_v1  ;;  %1467 = vmatprep.subr.bf16.mxu1 %v1634_v10  ;;  %v1620_v16 = vld [vmem:[%s2096_s0 + $0x18] sm:$0xff]   ;;  %v1623_v19 = vld [vmem:[%s2096_s0 + $0x30] sm:$0xff]   ;;  %v1625_v21 = vld [vmem:[%s2096_s0 + $0x40] sm:$0xff]  }
   0x8   :  { %1421 = vmatprep.subr.bf16.mxu0 %v1611_v2  ;;  %v1624_v20 = vld [vmem:[%s2096_s0 + $0x38] sm:$0xff]   ;;  %v1626_v22 = vld [vmem:[%s2096_s0 + $0x48] sm:$0xff]   ;;  %v1627_v23 = vld [vmem:[%s2096_s0 + $0x50] sm:$0xff]  }
   0x9   :  { %v1628_v24 = vld [vmem:[%s2096_s0 + $0x58] sm:$0xff]   ;;  %v1629_v25 = vld [vmem:[%s2096_s0 + $0x60] sm:$0xff]   ;;  %v1630_v26 = vld [vmem:[%s2096_s0 + $0x68] sm:$0xff]  }
   0xa   :  { %1468 = vmatpush3.bf16.msra.mxu1 %v1634_v10  ;;  %v1631_v27 = vld [vmem:[%s2096_s0 + $0x70] sm:$0xff]   ;;  %v1632_v28 = vld [vmem:[%s2096_s0 + $0x78] sm:$0xff]   ;;  %v1639_v30 = vld [vmem:[%s2097_s3 + $0x8] sm:$0xff]  }
   0xb   :  { %1422 = vmatpush3.bf16.msra.mxu0 %v1611_v2  ;;  %1469 = vmatprep.subr.bf16.mxu1 %v1635_v12  ;;  %v1638_v29 = vld [vmem:[%s2097_s3 + $0x10] sm:$0xff]   ;;  %v1640_v31 = vld [vmem:[%s2097_s3] sm:$0xff]   ;;  %v1641_v32 = vld [vmem:[%s2098_s5 + $0x38] sm:$0xff]  }
   0xc   :  { %1423 = vmatprep.subr.bf16.mxu0 %v1612_v3  ;;  %v1642_v33 = vld [vmem:[%s2098_s5 + $0x30] sm:$0xff]   ;;  %v1643_v34 = vld [vmem:[%s2098_s5 + $0x28] sm:$0xff]   ;;  %v1644_v35 = vld [vmem:[%s2098_s5 + $0x20] sm:$0xff]  }
   0xd   :  { %v1645_v36 = vld [vmem:[%s2098_s5 + $0x18] sm:$0xff]   ;;  %v1646_v37 = vld [vmem:[%s2098_s5 + $0x10] sm:$0xff]   ;;  %v1647_v38 = vld [vmem:[%s2098_s5 + $0x8] sm:$0xff]  }
   0xe   :  { %1470 = vmatpush3.bf16.msra.mxu1 %v1635_v12  ;;  %v1827_v41 = vld [vmem:[%s2099_s2] ss:$0 sm:$0xff] }
   0xf   :  { %1424 = vmatpush3.bf16.msra.mxu0 %v1612_v3  ;;  %1471 = vmatprep.subr.bf16.mxu1 %v1636_v14 }
  0x10   :  { %1425 = vmatprep.subr.bf16.mxu0 %v1613_v5 }
  0x12   :  { %1472 = vmatpush3.bf16.msra.mxu1 %v1636_v14 }
  0x13   :  { %1426 = vmatpush3.bf16.msra.mxu0 %v1613_v5  ;;  %1473 = vmatprep.subr.bf16.mxu1 %v1637_v15 }
  0x14   :  { %1427 = vmatprep.subr.bf16.mxu0 %v1614_v6 }
  0x16   :  { %1474 = vmatpush3.bf16.msra.mxu1 %v1637_v15 }
  0x17   :  { %1428 = vmatpush3.bf16.msra.mxu0 %v1614_v6  ;;  %1475 = vmatprep.subr.bf16.mxu1 %v1638_v29 }
  0x18   :  { %1429 = vmatprep.subr.bf16.mxu0 %v1615_v7 }
  0x1a   :  { %1476 = vmatpush3.bf16.msra.mxu1 %v1638_v29 }
  0x1b   :  { %1430 = vmatpush3.bf16.msra.mxu0 %v1615_v7  ;;  %1477 = vmatprep.subr.bf16.mxu1 %v1639_v30 }
  0x1c   :  { %1431 = vmatprep.subr.bf16.mxu0 %v1616_v8 }
  0x1e   :  { %1478 = vmatpush3.bf16.msra.mxu1 %v1639_v30 }
  0x1f   :  { %1432 = vmatpush3.bf16.msra.mxu0 %v1616_v8  ;;  %1479 = vmatprep.subr.bf16.mxu1 %v1640_v31 }
  0x20   :  { %1513 = vmatprep.subr.bf16.mxu0 %v1641_v32 }
  0x22   :  { %1434 = vmatmul.mubr.bf16.vlgmr.msra.gmra.mxu0 %v1618_v11  ;;  %1480 = vmatpush3.bf16.msra.mxu1 %v1640_v31 }
  0x23   :  { %1437 = vmatprep.mubr.bf16.mxu0 %v1619_v13  ;;  %1514 = vmatpush3.bf16.msra.mxu0 %v1641_v32 }
  0x24   :  { %1515 = vmatprep.subr.bf16.mxu0 %v1642_v33 }
  0x27   :  { %1516 = vmatpush3.bf16.msra.mxu0 %v1642_v33 }
  0x28   :  { %1517 = vmatprep.subr.bf16.mxu0 %v1643_v34 }
  0x2a   :  { %1438 = vmatmul.mubr.bf16.gmra.mxu0 %v1620_v16 }
  0x2b   :  { %1441 = vmatprep.mubr.bf16.mxu0 %v1621_v17  ;;  %1518 = vmatpush3.bf16.msra.mxu0 %v1643_v34 }
  0x2c   :  { %1519 = vmatprep.subr.bf16.mxu0 %v1644_v35 }
  0x2f   :  { %1520 = vmatpush3.bf16.msra.mxu0 %v1644_v35 }
  0x30   :  { %1521 = vmatprep.subr.bf16.mxu0 %v1645_v36 }
  0x32   :  { %1442 = vmatmul.mubr.bf16.gmra.mxu0 %v1622_v18 }
  0x33   :  { %1445 = vmatprep.mubr.bf16.mxu0 %v1623_v19  ;;  %1522 = vmatpush3.bf16.msra.mxu0 %v1645_v36 }
  0x34   :  { %1523 = vmatprep.subr.bf16.mxu0 %v1646_v37 }
  0x37   :  { %1524 = vmatpush3.bf16.msra.mxu0 %v1646_v37 }
  0x38   :  { %1525 = vmatprep.subr.bf16.mxu0 %v1647_v38 }
  0x3a   :  { %1446 = vmatmul.mubr.bf16.gmra.mxu0 %v1624_v20 }
  0x3b   :  { %1449 = vmatprep.mubr.bf16.mxu0 %v1625_v21  ;;  %1526 = vmatpush3.bf16.msra.mxu0 %v1647_v38 }
  0x42   :  { %1450 = vmatmul.mubr.bf16.gmra.mxu0 %v1626_v22 }
  0x43   :  { %1453 = vmatprep.mubr.bf16.mxu0 %v1627_v23 }
  0x4a   :  { %1454 = vmatmul.mubr.bf16.gmra.mxu0 %v1628_v24 }
  0x4b   :  { %1457 = vmatprep.mubr.bf16.mxu0 %v1629_v25 }
  0x52   :  { %1458 = vmatmul.mubr.bf16.gmra.mxu0 %v1630_v26 }
  0x53   :  { %1461 = vmatprep.mubr.bf16.mxu0 %v1631_v27 }
  0x5a   :  { %1462 = vmatmul.mubr.bf16.gmra.mxu0 %v1632_v28 }
  0xe2   :  { %v1435_v39 = vpop.f32.mrf.mxu0 }
  0xe3   :  { %v275_v45 = vadd.f32 %v1435_v39, %v1827_v41 }
  0xe4   :  { %v266_v40 = vpop.f32.mrf.mxu0 }
  0xe5   :  { %v267_v43 = vadd.f32 %v1827_v41, %v266_v40  ;;  %v395_v52 = vmax.f32 %v275_v45, 0.0 }
  0xe6   :  { %v1436_v42 = vpop.f32.mrf.mxu0 }
  0xe7   :  { %v278_v44 = vadd.f32 %v1436_v42, %v1827_v41  ;;  %v393_v50 = vmax.f32 %v267_v43, 0.0 }
  0xe8   :  { %v269_v46 = vpop.f32.mrf.mxu0 }
  0xe9   :  { %v270_v47 = vadd.f32 %v1827_v41, %v269_v46  ;;  %v396_v48 = vmax.f32 %v278_v44, 0.0 }
  0xea   :  { %v1439_v49 = vpop.f32.mrf.mxu0 }
  0xeb   :  { %v394_v51 = vmax.f32 %v270_v47, 0.0  ;;  %v426_v55 = vpack.c.bf16 %v396_v48, %v395_v52  ;;  %v291_v59 = vadd.f32 %v1439_v49, %v1827_v41 }
  0xec   :  { %v282_v53 = vpop.f32.mrf.mxu0 }
  0xed   :  { %v425_v54 = vpack.c.bf16 %v394_v51, %v393_v50  ;;  %v283_v57 = vadd.f32 %v1827_v41, %v282_v53  ;;  %v399_v2 = vmax.f32 %v291_v59, 0.0 }
  0xee   :  { %v1440_v56 = vpop.f32.mrf.mxu0 }
  0xef   :  { %v294_v58 = vadd.f32 %v1440_v56, %v1827_v41  ;;  %1481 = vmatprep.mubr.bf16.mxu1 %v425_v54  ;;  %v397_v0 = vmax.f32 %v283_v57, 0.0 }
  0xf0   :  { %v285_v60 = vpop.f32.mrf.mxu0  ;;  %1482 = vmatmul.mubr.bf16.vlgmr.msra.gmra.mxu1 %v426_v55 }
  0xf1   :  { %v286_v61 = vadd.f32 %v1827_v41, %v285_v60  ;;  %v400_v62 = vmax.f32 %v294_v58, 0.0 }
  0xf2   :  { %v1443_v63 = vpop.f32.mrf.mxu0 }
  0xf3   :  { %v398_v1 = vmax.f32 %v286_v61, 0.0  ;;  %v428_v5 = vpack.c.bf16 %v400_v62, %v399_v2  ;;  %v307_v9 = vadd.f32 %v1443_v63, %v1827_v41 }
  0xf4   :  { %v298_v3 = vpop.f32.mrf.mxu0 }
  0xf5   :  { %v427_v4 = vpack.c.bf16 %v398_v1, %v397_v0  ;;  %v299_v7 = vadd.f32 %v1827_v41, %v298_v3  ;;  %v403_v16 = vmax.f32 %v307_v9, 0.0 }
  0xf6   :  { %v1444_v6 = vpop.f32.mrf.mxu0 }
  0xf7   :  { %v310_v8 = vadd.f32 %v1444_v6, %v1827_v41  ;;  %1485 = vmatprep.mubr.bf16.mxu1 %v427_v4  ;;  %v401_v14 = vmax.f32 %v299_v7, 0.0 }
  0xf8   :  { %v301_v10 = vpop.f32.mrf.mxu0  ;;  %1486 = vmatmul.mubr.bf16.gmra.mxu1 %v428_v5 }
  0xf9   :  { %v302_v11 = vadd.f32 %v1827_v41, %v301_v10  ;;  %v404_v12 = vmax.f32 %v310_v8, 0.0 }
  0xfa   :  { %v1447_v13 = vpop.f32.mrf.mxu0 }
  0xfb   :  { %v402_v15 = vmax.f32 %v302_v11, 0.0  ;;  %v430_v19 = vpack.c.bf16 %v404_v12, %v403_v16  ;;  %v323_v23 = vadd.f32 %v1447_v13, %v1827_v41 }
  0xfc   :  { %v314_v17 = vpop.f32.mrf.mxu0 }
  0xfd   :  { %v429_v18 = vpack.c.bf16 %v402_v15, %v401_v14  ;;  %v315_v21 = vadd.f32 %v1827_v41, %v314_v17  ;;  %v407_v30 = vmax.f32 %v323_v23, 0.0 }
  0xfe   :  { %v1448_v20 = vpop.f32.mrf.mxu0 }
  0xff   :  { %v326_v22 = vadd.f32 %v1448_v20, %v1827_v41  ;;  %1489 = vmatprep.mubr.bf16.mxu1 %v429_v18  ;;  %v405_v28 = vmax.f32 %v315_v21, 0.0 }
 0x100   :  { %v317_v24 = vpop.f32.mrf.mxu0  ;;  %1490 = vmatmul.mubr.bf16.gmra.mxu1 %v430_v19 }
 0x101   :  { %v318_v25 = vadd.f32 %v1827_v41, %v317_v24  ;;  %v408_v26 = vmax.f32 %v326_v22, 0.0 }
 0x102   :  { %v1451_v27 = vpop.f32.mrf.mxu0 }
 0x103   :  { %v406_v29 = vmax.f32 %v318_v25, 0.0  ;;  %v432_v33 = vpack.c.bf16 %v408_v26, %v407_v30  ;;  %v339_v37 = vadd.f32 %v1451_v27, %v1827_v41  ;;  %v1648_v25 = vld [vmem:[%s2098_s5] sm:$0xff]   ;;  %v1649_v26 = vld [vmem:[%s2100_s7 + $0x38] sm:$0xff]   ;;  %v1651_v27 = vld [vmem:[%s2100_s7 + $0x28] sm:$0xff]  }
 0x104   :  { %v330_v31 = vpop.f32.mrf.mxu0  ;;  %1527 = vmatprep.subr.bf16.mxu0 %v1648_v25  ;;  %1561 = vmatprep.subr.bf16.mxu1 %v1649_v26  ;;  %v1654_v30 = vld [vmem:[%s2100_s7 + $0x10] sm:$0xff]  }
 0x105   :  { %v431_v32 = vpack.c.bf16 %v406_v29, %v405_v28  ;;  %v331_v35 = vadd.f32 %v1827_v41, %v330_v31  ;;  %v411_v45 = vmax.f32 %v339_v37, 0.0  ;;  %1528 = vmatpush3.bf16.msra.mxu0 %v1648_v25  ;;  %1562 = vmatpush3.bf16.msra.mxu1 %v1649_v26  ;;  %v1652_v28 = vld [vmem:[%s2100_s7 + $0x20] sm:$0xff]   ;;  %v1653_v29 = vld [vmem:[%s2100_s7 + $0x18] sm:$0xff]   ;;  %v1655_v31 = vld [vmem:[%s2100_s7 + $0x8] sm:$0xff]  }
 0x106   :  { %v1452_v34 = vpop.f32.mrf.mxu0 }
 0x107   :  { %v342_v36 = vadd.f32 %v1452_v34, %v1827_v41  ;;  %1493 = vmatprep.mubr.bf16.mxu1 %v431_v32  ;;  %v409_v43 = vmax.f32 %v331_v35, 0.0  ;;  %v1888_v34 = vld [vmem:[%s2101_s4] ss:$0 sm:$0xff] }
 0x108   :  { %v333_v38 = vpop.f32.mrf.mxu0  ;;  %1494 = vmatmul.mubr.bf16.gmra.mxu1 %v432_v33 }
 0x109   :  { %v334_v39 = vadd.f32 %v1827_v41, %v333_v38  ;;  %v412_v40 = vmax.f32 %v342_v36, 0.0 }
 0x10a   :  { %v1455_v42 = vpop.f32.mrf.mxu0 }
 0x10b   :  { %v410_v44 = vmax.f32 %v334_v39, 0.0  ;;  %v434_v48 = vpack.c.bf16 %v412_v40, %v411_v45  ;;  %v355_v52 = vadd.f32 %v1455_v42, %v1827_v41 }
 0x10c   :  { %v346_v46 = vpop.f32.mrf.mxu0 }
 0x10d   :  { %v433_v47 = vpack.c.bf16 %v410_v44, %v409_v43  ;;  %v347_v50 = vadd.f32 %v1827_v41, %v346_v46  ;;  %v415_v59 = vmax.f32 %v355_v52, 0.0 }
 0x10e   :  { %v1456_v49 = vpop.f32.mrf.mxu0 }
 0x10f   :  { %v358_v51 = vadd.f32 %v1456_v49, %v1827_v41  ;;  %1497 = vmatprep.mubr.bf16.mxu1 %v433_v47  ;;  %v413_v57 = vmax.f32 %v347_v50, 0.0 }
 0x110   :  { %v349_v53 = vpop.f32.mrf.mxu0  ;;  %1498 = vmatmul.mubr.bf16.gmra.mxu1 %v434_v48 }
 0x111   :  { %v350_v54 = vadd.f32 %v1827_v41, %v349_v53  ;;  %v416_v55 = vmax.f32 %v358_v51, 0.0 }
 0x112   :  { %v1459_v56 = vpop.f32.mrf.mxu0 }
 0x113   :  { %v414_v58 = vmax.f32 %v350_v54, 0.0  ;;  %v436_v62 = vpack.c.bf16 %v416_v55, %v415_v59  ;;  %v371_v2 = vadd.f32 %v1459_v56, %v1827_v41 }
 0x114   :  { %v362_v60 = vpop.f32.mrf.mxu0 }
 0x115   :  { %v435_v61 = vpack.c.bf16 %v414_v58, %v413_v57  ;;  %v363_v0 = vadd.f32 %v1827_v41, %v362_v60  ;;  %v419_v9 = vmax.f32 %v371_v2, 0.0 }
 0x116   :  { %v1460_v63 = vpop.f32.mrf.mxu0 }
 0x117   :  { %v374_v1 = vadd.f32 %v1460_v63, %v1827_v41  ;;  %1501 = vmatprep.mubr.bf16.mxu1 %v435_v61  ;;  %v417_v7 = vmax.f32 %v363_v0, 0.0 }
 0x118   :  { %v365_v3 = vpop.f32.mrf.mxu0  ;;  %1502 = vmatmul.mubr.bf16.gmra.mxu1 %v436_v62 }
 0x119   :  { %v366_v4 = vadd.f32 %v1827_v41, %v365_v3  ;;  %v420_v5 = vmax.f32 %v374_v1, 0.0 }
 0x11a   :  { %v1463_v6 = vpop.f32.mrf.mxu0 }
 0x11b   :  { %v418_v8 = vmax.f32 %v366_v4, 0.0  ;;  %v438_v12 = vpack.c.bf16 %v420_v5, %v419_v9  ;;  %v387_v16 = vadd.f32 %v1463_v6, %v1827_v41 }
 0x11c   :  { %v378_v10 = vpop.f32.mrf.mxu0 }
 0x11d   :  { %v437_v11 = vpack.c.bf16 %v418_v8, %v417_v7  ;;  %v379_v14 = vadd.f32 %v1827_v41, %v378_v10  ;;  %v423_v22 = vmax.f32 %v387_v16, 0.0 }
 0x11e   :  { %v1464_v13 = vpop.f32.mrf.mxu0 }
 0x11f   :  { %v390_v15 = vadd.f32 %v1464_v13, %v1827_v41  ;;  %1505 = vmatprep.mubr.bf16.mxu1 %v437_v11  ;;  %v421_v20 = vmax.f32 %v379_v14, 0.0 }
 0x120   :  { %v381_v17 = vpop.f32.mrf.mxu0  ;;  %1506 = vmatmul.mubr.bf16.gmra.mxu1 %v438_v12 }
 0x121   :  { %v382_v18 = vadd.f32 %v1827_v41, %v381_v17  ;;  %v424_v19 = vmax.f32 %v390_v15, 0.0  ;;  %v1650_v41 = vld [vmem:[%s2100_s7 + $0x30] sm:$0xff]  }
 0x122   :  { %1563 = vmatprep.subr.bf16.mxu1 %v1650_v41 }
 0x123   :  { %v422_v21 = vmax.f32 %v382_v18, 0.0  ;;  %v440_v24 = vpack.c.bf16 %v424_v19, %v423_v22  ;;  %1564 = vmatpush3.bf16.msra.mxu1 %v1650_v41 }
 0x124   :  { %1565 = vmatprep.subr.bf16.mxu1 %v1651_v27 }
 0x125   :  { %v439_v23 = vpack.c.bf16 %v422_v21, %v421_v20 }
 0x127   :  { %1509 = vmatprep.mubr.bf16.mxu1 %v439_v23  ;;  %1566 = vmatpush3.bf16.msra.mxu1 %v1651_v27 }
 0x128   :  { %1510 = vmatmul.mubr.bf16.gmra.mxu1 %v440_v24  ;;  %1567 = vmatprep.subr.bf16.mxu1 %v1652_v28 }
 0x12b   :  { %1568 = vmatpush3.bf16.msra.mxu1 %v1652_v28 }
 0x12c   :  { %1569 = vmatprep.subr.bf16.mxu1 %v1653_v29 }
 0x12f   :  { %1570 = vmatpush3.bf16.msra.mxu1 %v1653_v29 }
 0x130   :  { %1571 = vmatprep.subr.bf16.mxu1 %v1654_v30 }
 0x133   :  { %1572 = vmatpush3.bf16.msra.mxu1 %v1654_v30 }
 0x134   :  { %1573 = vmatprep.subr.bf16.mxu1 %v1655_v31 }
 0x137   :  { %1574 = vmatpush3.bf16.msra.mxu1 %v1655_v31 }
 0x1b0   :  { %v1483_v32 = vpop.f32.mrf.mxu1 }
 0x1b1   :  { %v555_v38 = vadd.f32 %v1483_v32, %v1888_v34 }
 0x1b2   :  { %v546_v33 = vpop.f32.mrf.mxu1 }
 0x1b3   :  { %v547_v36 = vadd.f32 %v1888_v34, %v546_v33  ;;  %v675_v46 = vmax.f32 %v555_v38, 0.0 }
 0x1b4   :  { %v1484_v35 = vpop.f32.mrf.mxu1 }
 0x1b5   :  { %v558_v37 = vadd.f32 %v1484_v35, %v1888_v34  ;;  %v673_v44 = vmax.f32 %v547_v36, 0.0 }
 0x1b6   :  { %v549_v39 = vpop.f32.mrf.mxu1 }
 0x1b7   :  { %v550_v40 = vadd.f32 %v1888_v34, %v549_v39  ;;  %v676_v42 = vmax.f32 %v558_v37, 0.0 }
 0x1b8   :  { %v1487_v43 = vpop.f32.mrf.mxu1 }
 0x1b9   :  { %v674_v45 = vmax.f32 %v550_v40, 0.0  ;;  %v706_v49 = vpack.c.bf16 %v676_v42, %v675_v46  ;;  %v571_v53 = vadd.f32 %v1487_v43, %v1888_v34 }
 0x1ba   :  { %v562_v47 = vpop.f32.mrf.mxu1 }
 0x1bb   :  { %v705_v48 = vpack.c.bf16 %v674_v45, %v673_v44  ;;  %v563_v51 = vadd.f32 %v1888_v34, %v562_v47  ;;  %v679_v60 = vmax.f32 %v571_v53, 0.0 }
 0x1bc   :  { %v1488_v50 = vpop.f32.mrf.mxu1 }
 0x1bd   :  { %v574_v52 = vadd.f32 %v1488_v50, %v1888_v34  ;;  %1529 = vmatprep.mubr.bf16.mxu0 %v705_v48  ;;  %v677_v58 = vmax.f32 %v563_v51, 0.0 }
 0x1be   :  { %v565_v54 = vpop.f32.mrf.mxu1  ;;  %1530 = vmatmul.mubr.bf16.vlgmr.msra.gmra.mxu0 %v706_v49 }
 0x1bf   :  { %v566_v55 = vadd.f32 %v1888_v34, %v565_v54  ;;  %v680_v56 = vmax.f32 %v574_v52, 0.0 }
 0x1c0   :  { %v1491_v57 = vpop.f32.mrf.mxu1 }
 0x1c1   :  { %v678_v59 = vmax.f32 %v566_v55, 0.0  ;;  %v708_v63 = vpack.c.bf16 %v680_v56, %v679_v60  ;;  %v587_v3 = vadd.f32 %v1491_v57, %v1888_v34 }
 0x1c2   :  { %v578_v61 = vpop.f32.mrf.mxu1 }
 0x1c3   :  { %v707_v62 = vpack.c.bf16 %v678_v59, %v677_v58  ;;  %v579_v1 = vadd.f32 %v1888_v34, %v578_v61  ;;  %v683_v10 = vmax.f32 %v587_v3, 0.0 }
 0x1c4   :  { %v1492_v0 = vpop.f32.mrf.mxu1 }
 0x1c5   :  { %v590_v2 = vadd.f32 %v1492_v0, %v1888_v34  ;;  %1533 = vmatprep.mubr.bf16.mxu0 %v707_v62  ;;  %v681_v8 = vmax.f32 %v579_v1, 0.0 }
 0x1c6   :  { %v581_v4 = vpop.f32.mrf.mxu1  ;;  %1534 = vmatmul.mubr.bf16.gmra.mxu0 %v708_v63 }
 0x1c7   :  { %v582_v5 = vadd.f32 %v1888_v34, %v581_v4  ;;  %v684_v6 = vmax.f32 %v590_v2, 0.0 }
 0x1c8   :  { %v1495_v7 = vpop.f32.mrf.mxu1 }
 0x1c9   :  { %v682_v9 = vmax.f32 %v582_v5, 0.0  ;;  %v710_v13 = vpack.c.bf16 %v684_v6, %v683_v10  ;;  %v603_v17 = vadd.f32 %v1495_v7, %v1888_v34 }
 0x1ca   :  { %v594_v11 = vpop.f32.mrf.mxu1 }
 0x1cb   :  { %v709_v12 = vpack.c.bf16 %v682_v9, %v681_v8  ;;  %v595_v15 = vadd.f32 %v1888_v34, %v594_v11  ;;  %v687_v24 = vmax.f32 %v603_v17, 0.0 }
 0x1cc   :  { %v1496_v14 = vpop.f32.mrf.mxu1 }
 0x1cd   :  { %v606_v16 = vadd.f32 %v1496_v14, %v1888_v34  ;;  %1537 = vmatprep.mubr.bf16.mxu0 %v709_v12  ;;  %v685_v22 = vmax.f32 %v595_v15, 0.0 }
 0x1ce   :  { %v597_v18 = vpop.f32.mrf.mxu1  ;;  %1538 = vmatmul.mubr.bf16.gmra.mxu0 %v710_v13 }
 0x1cf   :  { %v598_v19 = vadd.f32 %v1888_v34, %v597_v18  ;;  %v688_v20 = vmax.f32 %v606_v16, 0.0 }
 0x1d0   :  { %v1499_v21 = vpop.f32.mrf.mxu1 }
 0x1d1   :  { %v686_v23 = vmax.f32 %v598_v19, 0.0  ;;  %v712_v41 = vpack.c.bf16 %v688_v20, %v687_v24  ;;  %v619_v30 = vadd.f32 %v1499_v21, %v1888_v34  ;;  %v1656_v19 = vld [vmem:[%s2100_s7] sm:$0xff]  }
 0x1d2   :  { %v610_v25 = vpop.f32.mrf.mxu1  ;;  %1575 = vmatprep.subr.bf16.mxu1 %v1656_v19 }
 0x1d3   :  { %v711_v26 = vpack.c.bf16 %v686_v23, %v685_v22  ;;  %v611_v28 = vadd.f32 %v1888_v34, %v610_v25  ;;  %v691_v38 = vmax.f32 %v619_v30, 0.0  ;;  %1576 = vmatpush3.bf16.msra.mxu1 %v1656_v19 }
 0x1d4   :  { %v1500_v27 = vpop.f32.mrf.mxu1 }
 0x1d5   :  { %v622_v29 = vadd.f32 %v1500_v27, %v1888_v34  ;;  %1541 = vmatprep.mubr.bf16.mxu0 %v711_v26  ;;  %v689_v36 = vmax.f32 %v611_v28, 0.0 }
 0x1d6   :  { %v613_v31 = vpop.f32.mrf.mxu1  ;;  %1542 = vmatmul.mubr.bf16.gmra.mxu0 %v712_v41 }
 0x1d7   :  { %v614_v32 = vadd.f32 %v1888_v34, %v613_v31  ;;  %v692_v33 = vmax.f32 %v622_v29, 0.0 }
 0x1d8   :  { %v1503_v35 = vpop.f32.mrf.mxu1 }
 0x1d9   :  { %v690_v37 = vmax.f32 %v614_v32, 0.0  ;;  %v714_v42 = vpack.c.bf16 %v692_v33, %v691_v38  ;;  %v635_v46 = vadd.f32 %v1503_v35, %v1888_v34 }
 0x1da   :  { %v626_v39 = vpop.f32.mrf.mxu1 }
 0x1db   :  { %v713_v40 = vpack.c.bf16 %v690_v37, %v689_v36  ;;  %v627_v44 = vadd.f32 %v1888_v34, %v626_v39  ;;  %v695_v53 = vmax.f32 %v635_v46, 0.0 }
 0x1dc   :  { %v1504_v43 = vpop.f32.mrf.mxu1 }
 0x1dd   :  { %v638_v45 = vadd.f32 %v1504_v43, %v1888_v34  ;;  %1545 = vmatprep.mubr.bf16.mxu0 %v713_v40  ;;  %v693_v51 = vmax.f32 %v627_v44, 0.0 }
 0x1de   :  { %v629_v47 = vpop.f32.mrf.mxu1  ;;  %1546 = vmatmul.mubr.bf16.gmra.mxu0 %v714_v42 }
 0x1df   :  { %v630_v48 = vadd.f32 %v1888_v34, %v629_v47  ;;  %v696_v49 = vmax.f32 %v638_v45, 0.0 }
 0x1e0   :  { %v1507_v50 = vpop.f32.mrf.mxu1 }
 0x1e1   :  { %v694_v52 = vmax.f32 %v630_v48, 0.0  ;;  %v716_v56 = vpack.c.bf16 %v696_v49, %v695_v53  ;;  %v651_v60 = vadd.f32 %v1507_v50, %v1888_v34 }
 0x1e2   :  { %v642_v54 = vpop.f32.mrf.mxu1 }
 0x1e3   :  { %v715_v55 = vpack.c.bf16 %v694_v52, %v693_v51  ;;  %v643_v58 = vadd.f32 %v1888_v34, %v642_v54  ;;  %v699_v3 = vmax.f32 %v651_v60, 0.0 }
 0x1e4   :  { %v1508_v57 = vpop.f32.mrf.mxu1 }
 0x1e5   :  { %v654_v59 = vadd.f32 %v1508_v57, %v1888_v34  ;;  %1549 = vmatprep.mubr.bf16.mxu0 %v715_v55  ;;  %v697_v1 = vmax.f32 %v643_v58, 0.0 }
 0x1e6   :  { %v645_v61 = vpop.f32.mrf.mxu1  ;;  %1550 = vmatmul.mubr.bf16.gmra.mxu0 %v716_v56 }
 0x1e7   :  { %v646_v62 = vadd.f32 %v1888_v34, %v645_v61  ;;  %v700_v63 = vmax.f32 %v654_v59, 0.0 }
 0x1e8   :  { %v1511_v0 = vpop.f32.mrf.mxu1 }
 0x1e9   :  { %v698_v2 = vmax.f32 %v646_v62, 0.0  ;;  %v718_v6 = vpack.c.bf16 %v700_v63, %v699_v3  ;;  %v667_v10 = vadd.f32 %v1511_v0, %v1888_v34 }
 0x1ea   :  { %v658_v4 = vpop.f32.mrf.mxu1 }
 0x1eb   :  { %v717_v5 = vpack.c.bf16 %v698_v2, %v697_v1  ;;  %v659_v8 = vadd.f32 %v1888_v34, %v658_v4  ;;  %v703_v16 = vmax.f32 %v667_v10, 0.0 }
 0x1ec   :  { %v1512_v7 = vpop.f32.mrf.mxu1 }
 0x1ed   :  { %v670_v9 = vadd.f32 %v1512_v7, %v1888_v34  ;;  %1553 = vmatprep.mubr.bf16.mxu0 %v717_v5  ;;  %v701_v14 = vmax.f32 %v659_v8, 0.0 }
 0x1ee   :  { %v661_v11 = vpop.f32.mrf.mxu1  ;;  %1554 = vmatmul.mubr.bf16.gmra.mxu0 %v718_v6 }
 0x1ef   :  { %v662_v12 = vadd.f32 %v1888_v34, %v661_v11  ;;  %v704_v13 = vmax.f32 %v670_v9, 0.0  ;;  %v1928_v34 = vld [vmem:[%s2102_s6] ss:$0 sm:$0xff] }
 0x1f1   :  { %v702_v15 = vmax.f32 %v662_v12, 0.0  ;;  %v720_v18 = vpack.c.bf16 %v704_v13, %v703_v16 }
 0x1f3   :  { %v719_v17 = vpack.c.bf16 %v702_v15, %v701_v14 }
 0x1f5   :  { %1557 = vmatprep.mubr.bf16.mxu0 %v719_v17 }
 0x1f6   :  { %1558 = vmatmul.mubr.bf16.gmra.mxu0 %v720_v18 }
 0x27e   :  { %v1531_v20 = vpop.f32.mrf.mxu0 }
 0x27f   :  { %v835_v25 = vadd.f32 %v1531_v20, %v1928_v34 }
 0x280   :  { %v826_v21 = vpop.f32.mrf.mxu0 }
 0x281   :  { %v827_v23 = vadd.f32 %v1928_v34, %v826_v21  ;;  %v955_v31 = vmax.f32 %v835_v25, 0.0 }
 0x282   :  { %v1532_v22 = vpop.f32.mrf.mxu0 }
 0x283   :  { %v838_v24 = vadd.f32 %v1532_v22, %v1928_v34  ;;  %v953_v29 = vmax.f32 %v827_v23, 0.0 }
 0x284   :  { %v829_v26 = vpop.f32.mrf.mxu0 }
 0x285   :  { %v830_v41 = vadd.f32 %v1928_v34, %v829_v26  ;;  %v956_v27 = vmax.f32 %v838_v24, 0.0 }
 0x286   :  { %v1535_v28 = vpop.f32.mrf.mxu0 }
 0x287   :  { %v954_v30 = vmax.f32 %v830_v41, 0.0  ;;  %v986_v35 = vpack.c.bf16 %v956_v27, %v955_v31  ;;  %v851_v39 = vadd.f32 %v1535_v28, %v1928_v34 }
 0x288   :  { %v842_v32 = vpop.f32.mrf.mxu0 }
 0x289   :  { %v985_v33 = vpack.c.bf16 %v954_v30, %v953_v29  ;;  %v843_v37 = vadd.f32 %v1928_v34, %v842_v32  ;;  %v959_v47 = vmax.f32 %v851_v39, 0.0 }
 0x28a   :  { %v1536_v36 = vpop.f32.mrf.mxu0 }
 0x28b   :  { %v854_v38 = vadd.f32 %v1536_v36, %v1928_v34  ;;  %1577 = vmatprep.mubr.bf16.mxu1 %v985_v33  ;;  %v957_v45 = vmax.f32 %v843_v37, 0.0 }
 0x28c   :  { %v845_v40 = vpop.f32.mrf.mxu0  ;;  %1578 = vmatmul.mubr.bf16.vlgmr.msra.gmra.mxu1 %v986_v35 }
 0x28d   :  { %v846_v42 = vadd.f32 %v1928_v34, %v845_v40  ;;  %v960_v43 = vmax.f32 %v854_v38, 0.0 }
 0x28e   :  { %v1539_v44 = vpop.f32.mrf.mxu0 }
 0x28f   :  { %v958_v46 = vmax.f32 %v846_v42, 0.0  ;;  %v988_v50 = vpack.c.bf16 %v960_v43, %v959_v47  ;;  %v867_v54 = vadd.f32 %v1539_v44, %v1928_v34 }
 0x290   :  { %v858_v48 = vpop.f32.mrf.mxu0 }
 0x291   :  { %v987_v49 = vpack.c.bf16 %v958_v46, %v957_v45  ;;  %v859_v52 = vadd.f32 %v1928_v34, %v858_v48  ;;  %v963_v61 = vmax.f32 %v867_v54, 0.0 }
 0x292   :  { %v1540_v51 = vpop.f32.mrf.mxu0 }
 0x293   :  { %v870_v53 = vadd.f32 %v1540_v51, %v1928_v34  ;;  %1581 = vmatprep.mubr.bf16.mxu1 %v987_v49  ;;  %v961_v59 = vmax.f32 %v859_v52, 0.0 }
 0x294   :  { %v861_v55 = vpop.f32.mrf.mxu0  ;;  %1582 = vmatmul.mubr.bf16.gmra.mxu1 %v988_v50 }
 0x295   :  { %v862_v56 = vadd.f32 %v1928_v34, %v861_v55  ;;  %v964_v57 = vmax.f32 %v870_v53, 0.0 }
 0x296   :  { %v1543_v58 = vpop.f32.mrf.mxu0 }
 0x297   :  { %v962_v60 = vmax.f32 %v862_v56, 0.0  ;;  %v990_v0 = vpack.c.bf16 %v964_v57, %v963_v61  ;;  %v883_v4 = vadd.f32 %v1543_v58, %v1928_v34 }
 0x298   :  { %v874_v62 = vpop.f32.mrf.mxu0 }
 0x299   :  { %v989_v63 = vpack.c.bf16 %v962_v60, %v961_v59  ;;  %v875_v2 = vadd.f32 %v1928_v34, %v874_v62  ;;  %v967_v11 = vmax.f32 %v883_v4, 0.0 }
 0x29a   :  { %v1544_v1 = vpop.f32.mrf.mxu0 }
 0x29b   :  { %v886_v3 = vadd.f32 %v1544_v1, %v1928_v34  ;;  %1585 = vmatprep.mubr.bf16.mxu1 %v989_v63  ;;  %v965_v9 = vmax.f32 %v875_v2, 0.0 }
 0x29c   :  { %v877_v5 = vpop.f32.mrf.mxu0  ;;  %1586 = vmatmul.mubr.bf16.gmra.mxu1 %v990_v0 }
 0x29d   :  { %v878_v6 = vadd.f32 %v1928_v34, %v877_v5  ;;  %v968_v7 = vmax.f32 %v886_v3, 0.0 }
 0x29e   :  { %v1547_v8 = vpop.f32.mrf.mxu0 }
 0x29f   :  { %v966_v10 = vmax.f32 %v878_v6, 0.0  ;;  %v992_v14 = vpack.c.bf16 %v968_v7, %v967_v11  ;;  %v899_v18 = vadd.f32 %v1547_v8, %v1928_v34  ;;  %v1965_v6 = vld [vmem:[%s2103_s8] ss:$0 sm:$0xff] }
 0x2a0   :  { %v890_v12 = vpop.f32.mrf.mxu0 }
 0x2a1   :  { %v991_v13 = vpack.c.bf16 %v966_v10, %v965_v9  ;;  %v891_v16 = vadd.f32 %v1928_v34, %v890_v12  ;;  %v971_v25 = vmax.f32 %v899_v18, 0.0 }
 0x2a2   :  { %v1548_v15 = vpop.f32.mrf.mxu0 }
 0x2a3   :  { %v902_v17 = vadd.f32 %v1548_v15, %v1928_v34  ;;  %1589 = vmatprep.mubr.bf16.mxu1 %v991_v13  ;;  %v969_v23 = vmax.f32 %v891_v16, 0.0 }
 0x2a4   :  { %v893_v19 = vpop.f32.mrf.mxu0  ;;  %1590 = vmatmul.mubr.bf16.gmra.mxu1 %v992_v14 }
 0x2a5   :  { %v894_v20 = vadd.f32 %v1928_v34, %v893_v19  ;;  %v972_v21 = vmax.f32 %v902_v17, 0.0 }
 0x2a6   :  { %v1551_v22 = vpop.f32.mrf.mxu0 }
 0x2a7   :  { %v970_v24 = vmax.f32 %v894_v20, 0.0  ;;  %v994_v27 = vpack.c.bf16 %v972_v21, %v971_v25  ;;  %v915_v31 = vadd.f32 %v1551_v22, %v1928_v34 }
 0x2a8   :  { %v906_v26 = vpop.f32.mrf.mxu0 }
 0x2a9   :  { %v993_v41 = vpack.c.bf16 %v970_v24, %v969_v23  ;;  %v907_v29 = vadd.f32 %v1928_v34, %v906_v26  ;;  %v975_v39 = vmax.f32 %v915_v31, 0.0 }
 0x2aa   :  { %v1552_v28 = vpop.f32.mrf.mxu0 }
 0x2ab   :  { %v918_v30 = vadd.f32 %v1552_v28, %v1928_v34  ;;  %1593 = vmatprep.mubr.bf16.mxu1 %v993_v41  ;;  %v973_v37 = vmax.f32 %v907_v29, 0.0 }
 0x2ac   :  { %v909_v32 = vpop.f32.mrf.mxu0  ;;  %1594 = vmatmul.mubr.bf16.gmra.mxu1 %v994_v27 }
 0x2ad   :  { %v910_v33 = vadd.f32 %v1928_v34, %v909_v32  ;;  %v976_v35 = vmax.f32 %v918_v30, 0.0 }
 0x2ae   :  { %v1555_v36 = vpop.f32.mrf.mxu0 }
 0x2af   :  { %v974_v38 = vmax.f32 %v910_v33, 0.0  ;;  %v996_v43 = vpack.c.bf16 %v976_v35, %v975_v39  ;;  %v931_v47 = vadd.f32 %v1555_v36, %v1928_v34 }
 0x2b0   :  { %v922_v40 = vpop.f32.mrf.mxu0 }
 0x2b1   :  { %v995_v42 = vpack.c.bf16 %v974_v38, %v973_v37  ;;  %v923_v45 = vadd.f32 %v1928_v34, %v922_v40  ;;  %v979_v54 = vmax.f32 %v931_v47, 0.0 }
 0x2b2   :  { %v1556_v44 = vpop.f32.mrf.mxu0 }
 0x2b3   :  { %v934_v46 = vadd.f32 %v1556_v44, %v1928_v34  ;;  %1597 = vmatprep.mubr.bf16.mxu1 %v995_v42  ;;  %v977_v52 = vmax.f32 %v923_v45, 0.0 }
 0x2b4   :  { %v925_v48 = vpop.f32.mrf.mxu0  ;;  %1598 = vmatmul.mubr.bf16.gmra.mxu1 %v996_v43 }
 0x2b5   :  { %v926_v49 = vadd.f32 %v1928_v34, %v925_v48  ;;  %v980_v50 = vmax.f32 %v934_v46, 0.0 }
 0x2b6   :  { %v1559_v51 = vpop.f32.mrf.mxu0 }
 0x2b7   :  { %v978_v53 = vmax.f32 %v926_v49, 0.0  ;;  %v998_v57 = vpack.c.bf16 %v980_v50, %v979_v54  ;;  %v947_v61 = vadd.f32 %v1559_v51, %v1928_v34 }
 0x2b8   :  { %v938_v55 = vpop.f32.mrf.mxu0 }
 0x2b9   :  { %v997_v56 = vpack.c.bf16 %v978_v53, %v977_v52  ;;  %v939_v59 = vadd.f32 %v1928_v34, %v938_v55  ;;  %v983_v3 = vmax.f32 %v947_v61, 0.0 }
 0x2ba   :  { %v1560_v58 = vpop.f32.mrf.mxu0 }
 0x2bb   :  { %v950_v60 = vadd.f32 %v1560_v58, %v1928_v34  ;;  %1601 = vmatprep.mubr.bf16.mxu1 %v997_v56  ;;  %v981_v1 = vmax.f32 %v939_v59, 0.0 }
 0x2bc   :  { %v941_v62 = vpop.f32.mrf.mxu0  ;;  %1602 = vmatmul.mubr.bf16.gmra.mxu1 %v998_v57 }
 0x2bd   :  { %v942_v63 = vadd.f32 %v1928_v34, %v941_v62  ;;  %v984_v0 = vmax.f32 %v950_v60, 0.0 }
 0x2bf   :  { %v982_v2 = vmax.f32 %v942_v63, 0.0  ;;  %v1000_v5 = vpack.c.bf16 %v984_v0, %v983_v3 }
 0x2c1   :  { %v999_v4 = vpack.c.bf16 %v982_v2, %v981_v1 }
 0x2c3   :  { %1605 = vmatprep.mubr.bf16.mxu1 %v999_v4 }
 0x2c4   :  { %1606 = vmatmul.mubr.bf16.gmra.mxu1 %v1000_v5 }
 0x34c   :  { %v1579_v7 = vpop.f32.mrf.mxu1 }
 0x34d   :  { %v1115_v8 = vadd.f32 %v1579_v7, %v1965_v6 }
 0x34e   :  { %v1106_v9 = vpop.f32.mrf.mxu1 }
 0x34f   :  { %1235 = vst [vmem:[%s2104_s9 + $0x10] sm:$0xff] %v1115_v8  ;;  %v1107_v34 = vadd.f32 %v1965_v6, %v1106_v9 }
 0x350   :  { %v1580_v10 = vpop.f32.mrf.mxu1 }
 0x351   :  { %1233 = vst [vmem:[%s2104_s9] sm:$0xff] %v1107_v34  ;;  %v1118_v11 = vadd.f32 %v1580_v10, %v1965_v6 }
 0x352   :  { %v1109_v12 = vpop.f32.mrf.mxu1 }
 0x353   :  { %1236 = vst [vmem:[%s2104_s9 + $0x18] sm:$0xff] %v1118_v11  ;;  %v1110_v13 = vadd.f32 %v1965_v6, %v1109_v12 }
 0x354   :  { %v1583_v14 = vpop.f32.mrf.mxu1 }
 0x355   :  { %1234 = vst [vmem:[%s2104_s9 + $0x8] sm:$0xff] %v1110_v13  ;;  %v1131_v15 = vadd.f32 %v1583_v14, %v1965_v6 }
 0x356   :  { %v1122_v16 = vpop.f32.mrf.mxu1 }
 0x357   :  { %1239 = vst [vmem:[%s2104_s9 + $0x30] sm:$0xff] %v1131_v15  ;;  %v1123_v17 = vadd.f32 %v1965_v6, %v1122_v16 }
 0x358   :  { %v1584_v18 = vpop.f32.mrf.mxu1 }
 0x359   :  { %1237 = vst [vmem:[%s2104_s9 + $0x20] sm:$0xff] %v1123_v17  ;;  %v1134_v19 = vadd.f32 %v1584_v18, %v1965_v6 }
 0x35a   :  { %v1125_v20 = vpop.f32.mrf.mxu1 }
 0x35b   :  { %1240 = vst [vmem:[%s2104_s9 + $0x38] sm:$0xff] %v1134_v19  ;;  %v1126_v21 = vadd.f32 %v1965_v6, %v1125_v20 }
 0x35c   :  { %v1587_v22 = vpop.f32.mrf.mxu1 }
 0x35d   :  { %1238 = vst [vmem:[%s2104_s9 + $0x28] sm:$0xff] %v1126_v21  ;;  %v1147_v23 = vadd.f32 %v1587_v22, %v1965_v6 }
 0x35e   :  { %v1138_v24 = vpop.f32.mrf.mxu1 }
 0x35f   :  { %1243 = vst [vmem:[%s2104_s9 + $0x50] sm:$0xff] %v1147_v23  ;;  %v1139_v25 = vadd.f32 %v1965_v6, %v1138_v24 }
 0x360   :  { %v1588_v26 = vpop.f32.mrf.mxu1 }
 0x361   :  { %1241 = vst [vmem:[%s2104_s9 + $0x40] sm:$0xff] %v1139_v25  ;;  %v1150_v41 = vadd.f32 %v1588_v26, %v1965_v6 }
 0x362   :  { %v1141_v27 = vpop.f32.mrf.mxu1 }
 0x363   :  { %1244 = vst [vmem:[%s2104_s9 + $0x58] sm:$0xff] %v1150_v41  ;;  %v1142_v28 = vadd.f32 %v1965_v6, %v1141_v27 }
 0x364   :  { %v1591_v29 = vpop.f32.mrf.mxu1 }
 0x365   :  { %1242 = vst [vmem:[%s2104_s9 + $0x48] sm:$0xff] %v1142_v28  ;;  %v1163_v30 = vadd.f32 %v1591_v29, %v1965_v6 }
 0x366   :  { %v1154_v31 = vpop.f32.mrf.mxu1 }
 0x367   :  { %1247 = vst [vmem:[%s2104_s9 + $0x70] sm:$0xff] %v1163_v30  ;;  %v1155_v32 = vadd.f32 %v1965_v6, %v1154_v31 }
 0x368   :  { %v1592_v33 = vpop.f32.mrf.mxu1 }
 0x369   :  { %1245 = vst [vmem:[%s2104_s9 + $0x60] sm:$0xff] %v1155_v32  ;;  %v1166_v35 = vadd.f32 %v1592_v33, %v1965_v6 }
 0x36a   :  { %v1157_v36 = vpop.f32.mrf.mxu1 }
 0x36b   :  { %1248 = vst [vmem:[%s2104_s9 + $0x78] sm:$0xff] %v1166_v35  ;;  %v1158_v37 = vadd.f32 %v1965_v6, %v1157_v36 }
 0x36c   :  { %v1595_v38 = vpop.f32.mrf.mxu1 }
 0x36d   :  { %1246 = vst [vmem:[%s2104_s9 + $0x68] sm:$0xff] %v1158_v37  ;;  %v1179_v39 = vadd.f32 %v1595_v38, %v1965_v6 }
 0x36e   :  { %v1170_v40 = vpop.f32.mrf.mxu1 }
 0x36f   :  { %1251 = vst [vmem:[%s2104_s9 + $0x90] sm:$0xff] %v1179_v39  ;;  %v1171_v42 = vadd.f32 %v1965_v6, %v1170_v40 }
 0x370   :  { %v1596_v43 = vpop.f32.mrf.mxu1 }
 0x371   :  { %1249 = vst [vmem:[%s2104_s9 + $0x80] sm:$0xff] %v1171_v42  ;;  %v1182_v44 = vadd.f32 %v1596_v43, %v1965_v6 }
 0x372   :  { %v1173_v45 = vpop.f32.mrf.mxu1 }
 0x373   :  { %1252 = vst [vmem:[%s2104_s9 + $0x98] sm:$0xff] %v1182_v44  ;;  %v1174_v46 = vadd.f32 %v1965_v6, %v1173_v45 }
 0x374   :  { %v1599_v47 = vpop.f32.mrf.mxu1 }
 0x375   :  { %1250 = vst [vmem:[%s2104_s9 + $0x88] sm:$0xff] %v1174_v46  ;;  %v1195_v48 = vadd.f32 %v1599_v47, %v1965_v6 }
 0x376   :  { %v1186_v49 = vpop.f32.mrf.mxu1 }
 0x377   :  { %1255 = vst [vmem:[%s2104_s9 + $0xb0] sm:$0xff] %v1195_v48  ;;  %v1187_v50 = vadd.f32 %v1965_v6, %v1186_v49 }
 0x378   :  { %v1600_v51 = vpop.f32.mrf.mxu1 }
 0x379   :  { %1253 = vst [vmem:[%s2104_s9 + $0xa0] sm:$0xff] %v1187_v50  ;;  %v1198_v52 = vadd.f32 %v1600_v51, %v1965_v6 }
 0x37a   :  { %v1189_v53 = vpop.f32.mrf.mxu1 }
 0x37b   :  { %1256 = vst [vmem:[%s2104_s9 + $0xb8] sm:$0xff] %v1198_v52  ;;  %v1190_v54 = vadd.f32 %v1965_v6, %v1189_v53 }
 0x37c   :  { %v1603_v55 = vpop.f32.mrf.mxu1 }
 0x37d   :  { %1254 = vst [vmem:[%s2104_s9 + $0xa8] sm:$0xff] %v1190_v54  ;;  %v1211_v56 = vadd.f32 %v1603_v55, %v1965_v6 }
 0x37e   :  { %v1202_v57 = vpop.f32.mrf.mxu1 }
 0x37f   :  { %1259 = vst [vmem:[%s2104_s9 + $0xd0] sm:$0xff] %v1211_v56  ;;  %v1203_v58 = vadd.f32 %v1965_v6, %v1202_v57 }
 0x380   :  { %v1604_v59 = vpop.f32.mrf.mxu1 }
 0x381   :  { %1257 = vst [vmem:[%s2104_s9 + $0xc0] sm:$0xff] %v1203_v58  ;;  %v1214_v60 = vadd.f32 %v1604_v59, %v1965_v6 }
 0x382   :  { %v1205_v61 = vpop.f32.mrf.mxu1 }
 0x383   :  { %1260 = vst [vmem:[%s2104_s9 + $0xd8] sm:$0xff] %v1214_v60  ;;  %v1206_v62 = vadd.f32 %v1965_v6, %v1205_v61 }
 0x384   :  { %v1607_v63 = vpop.f32.mrf.mxu1 }
 0x385   :  { %1258 = vst [vmem:[%s2104_s9 + $0xc8] sm:$0xff] %v1206_v62  ;;  %v1227_v0 = vadd.f32 %v1607_v63, %v1965_v6 }
 0x386   :  { %v1218_v1 = vpop.f32.mrf.mxu1 }
 0x387   :  { %1263 = vst [vmem:[%s2104_s9 + $0xf0] sm:$0xff] %v1227_v0  ;;  %v1219_v2 = vadd.f32 %v1965_v6, %v1218_v1 }
 0x388   :  { %v1608_v3 = vpop.f32.mrf.mxu1 }
 0x389   :  { %1261 = vst [vmem:[%s2104_s9 + $0xe0] sm:$0xff] %v1219_v2  ;;  %v1230_v4 = vadd.f32 %v1608_v3, %v1965_v6 }
 0x38a   :  { %v1221_v5 = vpop.f32.mrf.mxu1 }
 0x38b   :  { %1264 = vst [vmem:[%s2104_s9 + $0xf8] sm:$0xff] %v1230_v4  ;;  %v1222_v7 = vadd.f32 %v1965_v6, %v1221_v5 }
 0x38d   :  { %1262 = vst [vmem:[%s2104_s9 + $0xe8] sm:$0xff] %v1222_v7 }

// kernel: fwd.1
= control target key start
LH: loop header
LB: loop body
LE: loop exit
PB: predicated region body
PF: predicated region fallthrough
CT: control target
= control target key end

     0   :  { %s2095_s1 = inlined_call_operand.vmem [shape: bf16[128,128], index: 1, kind: input, shape index: {}]   ;;  %s2096_s0 = inlined_call_operand.vmem [shape: bf16[256,128], index: 0, kind: input, shape index: {}]   ;;  %s2097_s3 = inlined_call_operand.vmem [shape: bf16[128,128], index: 3, kind: input, shape index: {}]   ;;  %s2098_s5 = inlined_call_operand.vmem [shape: bf16[128,128], index: 5, kind: input, shape index: {}]   ;;  %s2099_s2 = inlined_call_operand.vmem [shape: f32[1,128], index: 2, kind: input, shape index: {}]   ;;  %s2100_s7 = inlined_call_operand.vmem [shape: bf16[128,128], index: 7, kind: input, shape index: {}]   ;;  %s2101_s4 = inlined_call_operand.vmem [shape: f32[1,128], index: 4, kind: input, shape index: {}]   ;;  %s2102_s6 = inlined_call_operand.vmem [shape: f32[1,128], index: 6, kind: input, shape index: {}]   ;;  %s2103_s8 = inlined_call_operand.vmem [shape: f32[1,128], index: 8, kind: input, shape index: {}]   ;;  %s2104_s9 = inlined_call_operand.vmem [shape: f32[256,128], index: 9, kind: output, shape index: {}]  }
   0x1   :  { %v1609_v0 = vld [vmem:[%s2095_s1 + $0x38] sm:$0xff]   ;;  %v1610_v1 = vld [vmem:[%s2095_s1 + $0x30] sm:$0xff]   ;;  %v1611_v2 = vld [vmem:[%s2095_s1 + $0x28] sm:$0xff]  }
   0x2   :  { %1417 = vmatprep.subr.bf16.mxu0 %v1609_v0  ;;  %v1612_v3 = vld [vmem:[%s2095_s1 + $0x20] sm:$0xff]   ;;  %v1613_v5 = vld [vmem:[%s2095_s1 + $0x18] sm:$0xff]   ;;  %v1614_v6 = vld [vmem:[%s2095_s1 + $0x10] sm:$0xff]  }
   0x3   :  { %1418 = vmatpush3.bf16.msra.mxu0 %v1609_v0  ;;  %v1617_v4 = vld [vmem:[%s2096_s0] sm:$0xff]   ;;  %v1615_v7 = vld [vmem:[%s2095_s1 + $0x8] sm:$0xff]   ;;  %v1633_v9 = vld [vmem:[%s2097_s3 + $0x38] sm:$0xff]  }
   0x4   :  { %1419 = vmatprep.subr.bf16.mxu0 %v1610_v1  ;;  %1433 = vmatprep.mubr.bf16.mxu0 %v1617_v4  ;;  %v1616_v8 = vld [vmem:[%s2095_s1] sm:$0xff]   ;;  %v1634_v10 = vld [vmem:[%s2097_s3 + $0x30] sm:$0xff]   ;;  %v1618_v11 = vld [vmem:[%s2096_s0 + $0x8] sm:$0xff]  }
   0x5   :  { %1465 = vmatprep.subr.bf16.mxu1 %v1633_v9  ;;  %v1635_v12 = vld [vmem:[%s2097_s3 + $0x28] sm:$0xff]   ;;  %v1619_v13 = vld [vmem:[%s2096_s0 + $0x10] sm:$0xff]   ;;  %v1636_v14 = vld [vmem:[%s2097_s3 + $0x20] sm:$0xff]  }
   0x6   :  { %1466 = vmatpush3.bf16.msra.mxu1 %v1633_v9  ;;  %v1637_v15 = vld [vmem:[%s2097_s3 + $0x18] sm:$0xff]   ;;  %v1621_v17 = vld [vmem:[%s2096_s0 + $0x20] sm:$0xff]   ;;  %v1622_v18 = vld [vmem:[%s2096_s0 + $0x28] sm:$0xff]  }
   0x7   :  { %1420 = vmatpush3.bf16.msra.mxu0 %v1610_v1  ;;  %1467 = vmatprep.subr.bf16.mxu1 %v1634_v10  ;;  %v1620_v16 = vld [vmem:[%s2096_s0 + $0x18] sm:$0xff]   ;;  %v1623_v19 = vld [vmem:[%s2096_s0 + $0x30] sm:$0xff]   ;;  %v1625_v21 = vld [vmem:[%s2096_s0 + $0x40] sm:$0xff]  }
   0x8   :  { %1421 = vmatprep.subr.bf16.mxu0 %v1611_v2  ;;  %v1624_v20 = vld [vmem:[%s2096_s0 + $0x38] sm:$0xff]   ;;  %v1626_v22 = vld [vmem:[%s2096_s0 + $0x48] sm:$0xff]   ;;  %v1627_v23 = vld [vmem:[%s2096_s0 + $0x50] sm:$0xff]  }
   0x9   :  { %v1628_v24 = vld [vmem:[%s2096_s0 + $0x58] sm:$0xff]   ;;  %v1629_v25 = vld [vmem:[%s2096_s0 + $0x60] sm:$0xff]   ;;  %v1630_v26 = vld [vmem:[%s2096_s0 + $0x68] sm:$0xff]  }
   0xa   :  { %1468 = vmatpush3.bf16.msra.mxu1 %v1634_v10  ;;  %v1631_v27 = vld [vmem:[%s2096_s0 + $0x70] sm:$0xff]   ;;  %v1632_v28 = vld [vmem:[%s2096_s0 + $0x78] sm:$0xff]   ;;  %v1639_v30 = vld [vmem:[%s2097_s3 + $0x8] sm:$0xff]  }
   0xb   :  { %1422 = vmatpush3.bf16.msra.mxu0 %v1611_v2  ;;  %1469 = vmatprep.subr.bf16.mxu1 %v1635_v12  ;;  %v1638_v29 = vld [vmem:[%s2097_s3 + $0x10] sm:$0xff]   ;;  %v1640_v31 = vld [vmem:[%s2097_s3] sm:$0xff]   ;;  %v1641_v32 = vld [vmem:[%s2098_s5 + $0x38] sm:$0xff]  }
   0xc   :  { %1423 = vmatprep.subr.bf16.mxu0 %v1612_v3  ;;  %v1642_v33 = vld [vmem:[%s2098_s5 + $0x30] sm:$0xff]   ;;  %v1643_v34 = vld [vmem:[%s2098_s5 + $0x28] sm:$0xff]   ;;  %v1644_v35 = vld [vmem:[%s2098_s5 + $0x20] sm:$0xff]  }
   0xd   :  { %v1645_v36 = vld [vmem:[%s2098_s5 + $0x18] sm:$0xff]   ;;  %v1646_v37 = vld [vmem:[%s2098_s5 + $0x10] sm:$0xff]   ;;  %v1647_v38 = vld [vmem:[%s2098_s5 + $0x8] sm:$0xff]  }
   0xe   :  { %1470 = vmatpush3.bf16.msra.mxu1 %v1635_v12  ;;  %v1827_v41 = vld [vmem:[%s2099_s2] ss:$0 sm:$0xff] }
   0xf   :  { %1424 = vmatpush3.bf16.msra.mxu0 %v1612_v3  ;;  %1471 = vmatprep.subr.bf16.mxu1 %v1636_v14 }
  0x10   :  { %1425 = vmatprep.subr.bf16.mxu0 %v1613_v5 }
  0x12   :  { %1472 = vmatpush3.bf16.msra.mxu1 %v1636_v14 }
  0x13   :  { %1426 = vmatpush3.bf16.msra.mxu0 %v1613_v5  ;;  %1473 = vmatprep.subr.bf16.mxu1 %v1637_v15 }
  0x14   :  { %1427 = vmatprep.subr.bf16.mxu0 %v1614_v6 }
  0x16   :  { %1474 = vmatpush3.bf16.msra.mxu1 %v1637_v15 }
  0x17   :  { %1428 = vmatpush3.bf16.msra.mxu0 %v1614_v6  ;;  %1475 = vmatprep.subr.bf16.mxu1 %v1638_v29 }
  0x18   :  { %1429 = vmatprep.subr.bf16.mxu0 %v1615_v7 }
  0x1a   :  { %1476 = vmatpush3.bf16.msra.mxu1 %v1638_v29 }
  0x1b   :  { %1430 = vmatpush3.bf16.msra.mxu0 %v1615_v7  ;;  %1477 = vmatprep.subr.bf16.mxu1 %v1639_v30 }
  0x1c   :  { %1431 = vmatprep.subr.bf16.mxu0 %v1616_v8 }
  0x1e   :  { %1478 = vmatpush3.bf16.msra.mxu1 %v1639_v30 }
  0x1f   :  { %1432 = vmatpush3.bf16.msra.mxu0 %v1616_v8  ;;  %1479 = vmatprep.subr.bf16.mxu1 %v1640_v31 }
  0x20   :  { %1513 = vmatprep.subr.bf16.mxu0 %v1641_v32 }
  0x22   :  { %1434 = vmatmul.mubr.bf16.vlgmr.msra.gmra.mxu0 %v1618_v11  ;;  %1480 = vmatpush3.bf16.msra.mxu1 %v1640_v31 }
  0x23   :  { %1437 = vmatprep.mubr.bf16.mxu0 %v1619_v13  ;;  %1514 = vmatpush3.bf16.msra.mxu0 %v1641_v32 }
  0x24   :  { %1515 = vmatprep.subr.bf16.mxu0 %v1642_v33 }
  0x27   :  { %1516 = vmatpush3.bf16.msra.mxu0 %v1642_v33 }
  0x28   :  { %1517 = vmatprep.subr.bf16.mxu0 %v1643_v34 }
  0x2a   :  { %1438 = vmatmul.mubr.bf16.gmra.mxu0 %v1620_v16 }
  0x2b   :  { %1441 = vmatprep.mubr.bf16.mxu0 %v1621_v17  ;;  %1518 = vmatpush3.bf16.msra.mxu0 %v1643_v34 }
  0x2c   :  { %1519 = vmatprep.subr.bf16.mxu0 %v1644_v35 }
  0x2f   :  { %1520 = vmatpush3.bf16.msra.mxu0 %v1644_v35 }
  0x30   :  { %1521 = vmatprep.subr.bf16.mxu0 %v1645_v36 }
  0x32   :  { %1442 = vmatmul.mubr.bf16.gmra.mxu0 %v1622_v18 }
  0x33   :  { %1445 = vmatprep.mubr.bf16.mxu0 %v1623_v19  ;;  %1522 = vmatpush3.bf16.msra.mxu0 %v1645_v36 }
  0x34   :  { %1523 = vmatprep.subr.bf16.mxu0 %v1646_v37 }
  0x37   :  { %1524 = vmatpush3.bf16.msra.mxu0 %v1646_v37 }
  0x38   :  { %1525 = vmatprep.subr.bf16.mxu0 %v1647_v38 }
  0x3a   :  { %1446 = vmatmul.mubr.bf16.gmra.mxu0 %v1624_v20 }
  0x3b   :  { %1449 = vmatprep.mubr.bf16.mxu0 %v1625_v21  ;;  %1526 = vmatpush3.bf16.msra.mxu0 %v1647_v38 }
  0x42   :  { %1450 = vmatmul.mubr.bf16.gmra.mxu0 %v1626_v22 }
  0x43   :  { %1453 = vmatprep.mubr.bf16.mxu0 %v1627_v23 }
  0x4a   :  { %1454 = vmatmul.mubr.bf16.gmra.mxu0 %v1628_v24 }
  0x4b   :  { %1457 = vmatprep.mubr.bf16.mxu0 %v1629_v25 }
  0x52   :  { %1458 = vmatmul.mubr.bf16.gmra.mxu0 %v1630_v26 }
  0x53   :  { %1461 = vmatprep.mubr.bf16.mxu0 %v1631_v27 }
  0x5a   :  { %1462 = vmatmul.mubr.bf16.gmra.mxu0 %v1632_v28 }
  0xe2   :  { %v1435_v39 = vpop.f32.mrf.mxu0 }
  0xe3   :  { %v275_v45 = vadd.f32 %v1435_v39, %v1827_v41 }
  0xe4   :  { %v266_v40 = vpop.f32.mrf.mxu0 }
  0xe5   :  { %v267_v43 = vadd.f32 %v1827_v41, %v266_v40  ;;  %v395_v52 = vmax.f32 %v275_v45, 0.0 }
  0xe6   :  { %v1436_v42 = vpop.f32.mrf.mxu0 }
  0xe7   :  { %v278_v44 = vadd.f32 %v1436_v42, %v1827_v41  ;;  %v393_v50 = vmax.f32 %v267_v43, 0.0 }
  0xe8   :  { %v269_v46 = vpop.f32.mrf.mxu0 }
  0xe9   :  { %v270_v47 = vadd.f32 %v1827_v41, %v269_v46  ;;  %v396_v48 = vmax.f32 %v278_v44, 0.0 }
  0xea   :  { %v1439_v49 = vpop.f32.mrf.mxu0 }
  0xeb   :  { %v394_v51 = vmax.f32 %v270_v47, 0.0  ;;  %v426_v55 = vpack.c.bf16 %v396_v48, %v395_v52  ;;  %v291_v59 = vadd.f32 %v1439_v49, %v1827_v41 }
  0xec   :  { %v282_v53 = vpop.f32.mrf.mxu0 }
  0xed   :  { %v425_v54 = vpack.c.bf16 %v394_v51, %v393_v50  ;;  %v283_v57 = vadd.f32 %v1827_v41, %v282_v53  ;;  %v399_v2 = vmax.f32 %v291_v59, 0.0 }
  0xee   :  { %v1440_v56 = vpop.f32.mrf.mxu0 }
  0xef   :  { %v294_v58 = vadd.f32 %v1440_v56, %v1827_v41  ;;  %1481 = vmatprep.mubr.bf16.mxu1 %v425_v54  ;;  %v397_v0 = vmax.f32 %v283_v57, 0.0 }
  0xf0   :  { %v285_v60 = vpop.f32.mrf.mxu0  ;;  %1482 = vmatmul.mubr.bf16.vlgmr.msra.gmra.mxu1 %v426_v55 }
  0xf1   :  { %v286_v61 = vadd.f32 %v1827_v41, %v285_v60  ;;  %v400_v62 = vmax.f32 %v294_v58, 0.0 }
  0xf2   :  { %v1443_v63 = vpop.f32.mrf.mxu0 }
  0xf3   :  { %v398_v1 = vmax.f32 %v286_v61, 0.0  ;;  %v428_v5 = vpack.c.bf16 %v400_v62, %v399_v2  ;;  %v307_v9 = vadd.f32 %v1443_v63, %v1827_v41 }
  0xf4   :  { %v298_v3 = vpop.f32.mrf.mxu0 }
  0xf5   :  { %v427_v4 = vpack.c.bf16 %v398_v1, %v397_v0  ;;  %v299_v7 = vadd.f32 %v1827_v41, %v298_v3  ;;  %v403_v16 = vmax.f32 %v307_v9, 0.0 }
  0xf6   :  { %v1444_v6 = vpop.f32.mrf.mxu0 }
  0xf7   :  { %v310_v8 = vadd.f32 %v1444_v6, %v1827_v41  ;;  %1485 = vmatprep.mubr.bf16.mxu1 %v427_v4  ;;  %v401_v14 = vmax.f32 %v299_v7, 0.0 }
  0xf8   :  { %v301_v10 = vpop.f32.mrf.mxu0  ;;  %1486 = vmatmul.mubr.bf16.gmra.mxu1 %v428_v5 }
  0xf9   :  { %v302_v11 = vadd.f32 %v1827_v41, %v301_v10  ;;  %v404_v12 = vmax.f32 %v310_v8, 0.0 }
  0xfa   :  { %v1447_v13 = vpop.f32.mrf.mxu0 }
  0xfb   :  { %v402_v15 = vmax.f32 %v302_v11, 0.0  ;;  %v430_v19 = vpack.c.bf16 %v404_v12, %v403_v16  ;;  %v323_v23 = vadd.f32 %v1447_v13, %v1827_v41 }
  0xfc   :  { %v314_v17 = vpop.f32.mrf.mxu0 }
  0xfd   :  { %v429_v18 = vpack.c.bf16 %v402_v15, %v401_v14  ;;  %v315_v21 = vadd.f32 %v1827_v41, %v314_v17  ;;  %v407_v30 = vmax.f32 %v323_v23, 0.0 }
  0xfe   :  { %v1448_v20 = vpop.f32.mrf.mxu0 }
  0xff   :  { %v326_v22 = vadd.f32 %v1448_v20, %v1827_v41  ;;  %1489 = vmatprep.mubr.bf16.mxu1 %v429_v18  ;;  %v405_v28 = vmax.f32 %v315_v21, 0.0 }
 0x100   :  { %v317_v24 = vpop.f32.mrf.mxu0  ;;  %1490 = vmatmul.mubr.bf16.gmra.mxu1 %v430_v19 }
 0x101   :  { %v318_v25 = vadd.f32 %v1827_v41, %v317_v24  ;;  %v408_v26 = vmax.f32 %v326_v22, 0.0 }
 0x102   :  { %v1451_v27 = vpop.f32.mrf.mxu0 }
 0x103   :  { %v406_v29 = vmax.f32 %v318_v25, 0.0  ;;  %v432_v33 = vpack.c.bf16 %v408_v26, %v407_v30  ;;  %v339_v37 = vadd.f32 %v1451_v27, %v1827_v41  ;;  %v1648_v25 = vld [vmem:[%s2098_s5] sm:$0xff]   ;;  %v1649_v26 = vld [vmem:[%s2100_s7 + $0x38] sm:$0xff]   ;;  %v1651_v27 = vld [vmem:[%s2100_s7 + $0x28] sm:$0xff]  }
 0x104   :  { %v330_v31 = vpop.f32.mrf.mxu0  ;;  %1527 = vmatprep.subr.bf16.mxu0 %v1648_v25  ;;  %1561 = vmatprep.subr.bf16.mxu1 %v1649_v26  ;;  %v1654_v30 = vld [vmem:[%s2100_s7 + $0x10] sm:$0xff]  }
 0x105   :  { %v431_v32 = vpack.c.bf16 %v406_v29, %v405_v28  ;;  %v331_v35 = vadd.f32 %v1827_v41, %v330_v31  ;;  %v411_v45 = vmax.f32 %v339_v37, 0.0  ;;  %1528 = vmatpush3.bf16.msra.mxu0 %v1648_v25  ;;  %1562 = vmatpush3.bf16.msra.mxu1 %v1649_v26  ;;  %v1652_v28 = vld [vmem:[%s2100_s7 + $0x20] sm:$0xff]   ;;  %v1653_v29 = vld [vmem:[%s2100_s7 + $0x18] sm:$0xff]   ;;  %v1655_v31 = vld [vmem:[%s2100_s7 + $0x8] sm:$0xff]  }
 0x106   :  { %v1452_v34 = vpop.f32.mrf.mxu0 }
 0x107   :  { %v342_v36 = vadd.f32 %v1452_v34, %v1827_v41  ;;  %1493 = vmatprep.mubr.bf16.mxu1 %v431_v32  ;;  %v409_v43 = vmax.f32 %v331_v35, 0.0  ;;  %v1888_v34 = vld [vmem:[%s2101_s4] ss:$0 sm:$0xff] }
 0x108   :  { %v333_v38 = vpop.f32.mrf.mxu0  ;;  %1494 = vmatmul.mubr.bf16.gmra.mxu1 %v432_v33 }
 0x109   :  { %v334_v39 = vadd.f32 %v1827_v41, %v333_v38  ;;  %v412_v40 = vmax.f32 %v342_v36, 0.0 }
 0x10a   :  { %v1455_v42 = vpop.f32.mrf.mxu0 }
 0x10b   :  { %v410_v44 = vmax.f32 %v334_v39, 0.0  ;;  %v434_v48 = vpack.c.bf16 %v412_v40, %v411_v45  ;;  %v355_v52 = vadd.f32 %v1455_v42, %v1827_v41 }
 0x10c   :  { %v346_v46 = vpop.f32.mrf.mxu0 }
 0x10d   :  { %v433_v47 = vpack.c.bf16 %v410_v44, %v409_v43  ;;  %v347_v50 = vadd.f32 %v1827_v41, %v346_v46  ;;  %v415_v59 = vmax.f32 %v355_v52, 0.0 }
 0x10e   :  { %v1456_v49 = vpop.f32.mrf.mxu0 }
 0x10f   :  { %v358_v51 = vadd.f32 %v1456_v49, %v1827_v41  ;;  %1497 = vmatprep.mubr.bf16.mxu1 %v433_v47  ;;  %v413_v57 = vmax.f32 %v347_v50, 0.0 }
 0x110   :  { %v349_v53 = vpop.f32.mrf.mxu0  ;;  %1498 = vmatmul.mubr.bf16.gmra.mxu1 %v434_v48 }
 0x111   :  { %v350_v54 = vadd.f32 %v1827_v41, %v349_v53  ;;  %v416_v55 = vmax.f32 %v358_v51, 0.0 }
 0x112   :  { %v1459_v56 = vpop.f32.mrf.mxu0 }
 0x113   :  { %v414_v58 = vmax.f32 %v350_v54, 0.0  ;;  %v436_v62 = vpack.c.bf16 %v416_v55, %v415_v59  ;;  %v371_v2 = vadd.f32 %v1459_v56, %v1827_v41 }
 0x114   :  { %v362_v60 = vpop.f32.mrf.mxu0 }
 0x115   :  { %v435_v61 = vpack.c.bf16 %v414_v58, %v413_v57  ;;  %v363_v0 = vadd.f32 %v1827_v41, %v362_v60  ;;  %v419_v9 = vmax.f32 %v371_v2, 0.0 }
 0x116   :  { %v1460_v63 = vpop.f32.mrf.mxu0 }
 0x117   :  { %v374_v1 = vadd.f32 %v1460_v63, %v1827_v41  ;;  %1501 = vmatprep.mubr.bf16.mxu1 %v435_v61  ;;  %v417_v7 = vmax.f32 %v363_v0, 0.0 }
 0x118   :  { %v365_v3 = vpop.f32.mrf.mxu0  ;;  %1502 = vmatmul.mubr.bf16.gmra.mxu1 %v436_v62 }
 0x119   :  { %v366_v4 = vadd.f32 %v1827_v41, %v365_v3  ;;  %v420_v5 = vmax.f32 %v374_v1, 0.0 }
 0x11a   :  { %v1463_v6 = vpop.f32.mrf.mxu0 }
 0x11b   :  { %v418_v8 = vmax.f32 %v366_v4, 0.0  ;;  %v438_v12 = vpack.c.bf16 %v420_v5, %v419_v9  ;;  %v387_v16 = vadd.f32 %v1463_v6, %v1827_v41 }
 0x11c   :  { %v378_v10 = vpop.f32.mrf.mxu0 }
 0x11d   :  { %v437_v11 = vpack.c.bf16 %v418_v8, %v417_v7  ;;  %v379_v14 = vadd.f32 %v1827_v41, %v378_v10  ;;  %v423_v22 = vmax.f32 %v387_v16, 0.0 }
 0x11e   :  { %v1464_v13 = vpop.f32.mrf.mxu0 }
 0x11f   :  { %v390_v15 = vadd.f32 %v1464_v13, %v1827_v41  ;;  %1505 = vmatprep.mubr.bf16.mxu1 %v437_v11  ;;  %v421_v20 = vmax.f32 %v379_v14, 0.0 }
 0x120   :  { %v381_v17 = vpop.f32.mrf.mxu0  ;;  %1506 = vmatmul.mubr.bf16.gmra.mxu1 %v438_v12 }
 0x121   :  { %v382_v18 = vadd.f32 %v1827_v41, %v381_v17  ;;  %v424_v19 = vmax.f32 %v390_v15, 0.0  ;;  %v1650_v41 = vld [vmem:[%s2100_s7 + $0x30] sm:$0xff]  }
 0x122   :  { %1563 = vmatprep.subr.bf16.mxu1 %v1650_v41 }
 0x123   :  { %v422_v21 = vmax.f32 %v382_v18, 0.0  ;;  %v440_v24 = vpack.c.bf16 %v424_v19, %v423_v22  ;;  %1564 = vmatpush3.bf16.msra.mxu1 %v1650_v41 }
 0x124   :  { %1565 = vmatprep.subr.bf16.mxu1 %v1651_v27 }
 0x125   :  { %v439_v23 = vpack.c.bf16 %v422_v21, %v421_v20 }
 0x127   :  { %1509 = vmatprep.mubr.bf16.mxu1 %v439_v23  ;;  %1566 = vmatpush3.bf16.msra.mxu1 %v1651_v27 }
 0x128   :  { %1510 = vmatmul.mubr.bf16.gmra.mxu1 %v440_v24  ;;  %1567 = vmatprep.subr.bf16.mxu1 %v1652_v28 }
 0x12b   :  { %1568 = vmatpush3.bf16.msra.mxu1 %v1652_v28 }
 0x12c   :  { %1569 = vmatprep.subr.bf16.mxu1 %v1653_v29 }
 0x12f   :  { %1570 = vmatpush3.bf16.msra.mxu1 %v1653_v29 }
 0x130   :  { %1571 = vmatprep.subr.bf16.mxu1 %v1654_v30 }
 0x133   :  { %1572 = vmatpush3.bf16.msra.mxu1 %v1654_v30 }
 0x134   :  { %1573 = vmatprep.subr.bf16.mxu1 %v1655_v31 }
 0x137   :  { %1574 = vmatpush3.bf16.msra.mxu1 %v1655_v31 }
 0x1b0   :  { %v1483_v32 = vpop.f32.mrf.mxu1 }
 0x1b1   :  { %v555_v38 = vadd.f32 %v1483_v32, %v1888_v34 }
 0x1b2   :  { %v546_v33 = vpop.f32.mrf.mxu1 }
 0x1b3   :  { %v547_v36 = vadd.f32 %v1888_v34, %v546_v33  ;;  %v675_v46 = vmax.f32 %v555_v38, 0.0 }
 0x1b4   :  { %v1484_v35 = vpop.f32.mrf.mxu1 }
 0x1b5   :  { %v558_v37 = vadd.f32 %v1484_v35, %v1888_v34  ;;  %v673_v44 = vmax.f32 %v547_v36, 0.0 }
 0x1b6   :  { %v549_v39 = vpop.f32.mrf.mxu1 }
 0x1b7   :  { %v550_v40 = vadd.f32 %v1888_v34, %v549_v39  ;;  %v676_v42 = vmax.f32 %v558_v37, 0.0 }
 0x1b8   :  { %v1487_v43 = vpop.f32.mrf.mxu1 }
 0x1b9   :  { %v674_v45 = vmax.f32 %v550_v40, 0.0  ;;  %v706_v49 = vpack.c.bf16 %v676_v42, %v675_v46  ;;  %v571_v53 = vadd.f32 %v1487_v43, %v1888_v34 }
 0x1ba   :  { %v562_v47 = vpop.f32.mrf.mxu1 }
 0x1bb   :  { %v705_v48 = vpack.c.bf16 %v674_v45, %v673_v44  ;;  %v563_v51 = vadd.f32 %v1888_v34, %v562_v47  ;;  %v679_v60 = vmax.f32 %v571_v53, 0.0 }
 0x1bc   :  { %v1488_v50 = vpop.f32.mrf.mxu1 }
 0x1bd   :  { %v574_v52 = vadd.f32 %v1488_v50, %v1888_v34  ;;  %1529 = vmatprep.mubr.bf16.mxu0 %v705_v48  ;;  %v677_v58 = vmax.f32 %v563_v51, 0.0 }
 0x1be   :  { %v565_v54 = vpop.f32.mrf.mxu1  ;;  %1530 = vmatmul.mubr.bf16.vlgmr.msra.gmra.mxu0 %v706_v49 }
 0x1bf   :  { %v566_v55 = vadd.f32 %v1888_v34, %v565_v54  ;;  %v680_v56 = vmax.f32 %v574_v52, 0.0 }
 0x1c0   :  { %v1491_v57 = vpop.f32.mrf.mxu1 }
 0x1c1   :  { %v678_v59 = vmax.f32 %v566_v55, 0.0  ;;  %v708_v63 = vpack.c.bf16 %v680_v56, %v679_v60  ;;  %v587_v3 = vadd.f32 %v1491_v57, %v1888_v34 }
 0x1c2   :  { %v578_v61 = vpop.f32.mrf.mxu1 }
 0x1c3   :  { %v707_v62 = vpack.c.bf16 %v678_v59, %v677_v58  ;;  %v579_v1 = vadd.f32 %v1888_v34, %v578_v61  ;;  %v683_v10 = vmax.f32 %v587_v3, 0.0 }
 0x1c4   :  { %v1492_v0 = vpop.f32.mrf.mxu1 }
 0x1c5   :  { %v590_v2 = vadd.f32 %v1492_v0, %v1888_v34  ;;  %1533 = vmatprep.mubr.bf16.mxu0 %v707_v62  ;;  %v681_v8 = vmax.f32 %v579_v1, 0.0 }
 0x1c6   :  { %v581_v4 = vpop.f32.mrf.mxu1  ;;  %1534 = vmatmul.mubr.bf16.gmra.mxu0 %v708_v63 }
 0x1c7   :  { %v582_v5 = vadd.f32 %v1888_v34, %v581_v4  ;;  %v684_v6 = vmax.f32 %v590_v2, 0.0 }
 0x1c8   :  { %v1495_v7 = vpop.f32.mrf.mxu1 }
 0x1c9   :  { %v682_v9 = vmax.f32 %v582_v5, 0.0  ;;  %v710_v13 = vpack.c.bf16 %v684_v6, %v683_v10  ;;  %v603_v17 = vadd.f32 %v1495_v7, %v1888_v34 }
 0x1ca   :  { %v594_v11 = vpop.f32.mrf.mxu1 }
 0x1cb   :  { %v709_v12 = vpack.c.bf16 %v682_v9, %v681_v8  ;;  %v595_v15 = vadd.f32 %v1888_v34, %v594_v11  ;;  %v687_v24 = vmax.f32 %v603_v17, 0.0 }
 0x1cc   :  { %v1496_v14 = vpop.f32.mrf.mxu1 }
 0x1cd   :  { %v606_v16 = vadd.f32 %v1496_v14, %v1888_v34  ;;  %1537 = vmatprep.mubr.bf16.mxu0 %v709_v12  ;;  %v685_v22 = vmax.f32 %v595_v15, 0.0 }
 0x1ce   :  { %v597_v18 = vpop.f32.mrf.mxu1  ;;  %1538 = vmatmul.mubr.bf16.gmra.mxu0 %v710_v13 }
 0x1cf   :  { %v598_v19 = vadd.f32 %v1888_v34, %v597_v18  ;;  %v688_v20 = vmax.f32 %v606_v16, 0.0 }
 0x1d0   :  { %v1499_v21 = vpop.f32.mrf.mxu1 }
 0x1d1   :  { %v686_v23 = vmax.f32 %v598_v19, 0.0  ;;  %v712_v41 = vpack.c.bf16 %v688_v20, %v687_v24  ;;  %v619_v30 = vadd.f32 %v1499_v21, %v1888_v34  ;;  %v1656_v19 = vld [vmem:[%s2100_s7] sm:$0xff]  }
 0x1d2   :  { %v610_v25 = vpop.f32.mrf.mxu1  ;;  %1575 = vmatprep.subr.bf16.mxu1 %v1656_v19 }
 0x1d3   :  { %v711_v26 = vpack.c.bf16 %v686_v23, %v685_v22  ;;  %v611_v28 = vadd.f32 %v1888_v34, %v610_v25  ;;  %v691_v38 = vmax.f32 %v619_v30, 0.0  ;;  %1576 = vmatpush3.bf16.msra.mxu1 %v1656_v19 }
 0x1d4   :  { %v1500_v27 = vpop.f32.mrf.mxu1 }
 0x1d5   :  { %v622_v29 = vadd.f32 %v1500_v27, %v1888_v34  ;;  %1541 = vmatprep.mubr.bf16.mxu0 %v711_v26  ;;  %v689_v36 = vmax.f32 %v611_v28, 0.0 }
 0x1d6   :  { %v613_v31 = vpop.f32.mrf.mxu1  ;;  %1542 = vmatmul.mubr.bf16.gmra.mxu0 %v712_v41 }
 0x1d7   :  { %v614_v32 = vadd.f32 %v1888_v34, %v613_v31  ;;  %v692_v33 = vmax.f32 %v622_v29, 0.0 }
 0x1d8   :  { %v1503_v35 = vpop.f32.mrf.mxu1 }
 0x1d9   :  { %v690_v37 = vmax.f32 %v614_v32, 0.0  ;;  %v714_v42 = vpack.c.bf16 %v692_v33, %v691_v38  ;;  %v635_v46 = vadd.f32 %v1503_v35, %v1888_v34 }
 0x1da   :  { %v626_v39 = vpop.f32.mrf.mxu1 }
 0x1db   :  { %v713_v40 = vpack.c.bf16 %v690_v37, %v689_v36  ;;  %v627_v44 = vadd.f32 %v1888_v34, %v626_v39  ;;  %v695_v53 = vmax.f32 %v635_v46, 0.0 }
 0x1dc   :  { %v1504_v43 = vpop.f32.mrf.mxu1 }
 0x1dd   :  { %v638_v45 = vadd.f32 %v1504_v43, %v1888_v34  ;;  %1545 = vmatprep.mubr.bf16.mxu0 %v713_v40  ;;  %v693_v51 = vmax.f32 %v627_v44, 0.0 }
 0x1de   :  { %v629_v47 = vpop.f32.mrf.mxu1  ;;  %1546 = vmatmul.mubr.bf16.gmra.mxu0 %v714_v42 }
 0x1df   :  { %v630_v48 = vadd.f32 %v1888_v34, %v629_v47  ;;  %v696_v49 = vmax.f32 %v638_v45, 0.0 }
 0x1e0   :  { %v1507_v50 = vpop.f32.mrf.mxu1 }
 0x1e1   :  { %v694_v52 = vmax.f32 %v630_v48, 0.0  ;;  %v716_v56 = vpack.c.bf16 %v696_v49, %v695_v53  ;;  %v651_v60 = vadd.f32 %v1507_v50, %v1888_v34 }
 0x1e2   :  { %v642_v54 = vpop.f32.mrf.mxu1 }
 0x1e3   :  { %v715_v55 = vpack.c.bf16 %v694_v52, %v693_v51  ;;  %v643_v58 = vadd.f32 %v1888_v34, %v642_v54  ;;  %v699_v3 = vmax.f32 %v651_v60, 0.0 }
 0x1e4   :  { %v1508_v57 = vpop.f32.mrf.mxu1 }
 0x1e5   :  { %v654_v59 = vadd.f32 %v1508_v57, %v1888_v34  ;;  %1549 = vmatprep.mubr.bf16.mxu0 %v715_v55  ;;  %v697_v1 = vmax.f32 %v643_v58, 0.0 }
 0x1e6   :  { %v645_v61 = vpop.f32.mrf.mxu1  ;;  %1550 = vmatmul.mubr.bf16.gmra.mxu0 %v716_v56 }
 0x1e7   :  { %v646_v62 = vadd.f32 %v1888_v34, %v645_v61  ;;  %v700_v63 = vmax.f32 %v654_v59, 0.0 }
 0x1e8   :  { %v1511_v0 = vpop.f32.mrf.mxu1 }
 0x1e9   :  { %v698_v2 = vmax.f32 %v646_v62, 0.0  ;;  %v718_v6 = vpack.c.bf16 %v700_v63, %v699_v3  ;;  %v667_v10 = vadd.f32 %v1511_v0, %v1888_v34 }
 0x1ea   :  { %v658_v4 = vpop.f32.mrf.mxu1 }
 0x1eb   :  { %v717_v5 = vpack.c.bf16 %v698_v2, %v697_v1  ;;  %v659_v8 = vadd.f32 %v1888_v34, %v658_v4  ;;  %v703_v16 = vmax.f32 %v667_v10, 0.0 }
 0x1ec   :  { %v1512_v7 = vpop.f32.mrf.mxu1 }
 0x1ed   :  { %v670_v9 = vadd.f32 %v1512_v7, %v1888_v34  ;;  %1553 = vmatprep.mubr.bf16.mxu0 %v717_v5  ;;  %v701_v14 = vmax.f32 %v659_v8, 0.0 }
 0x1ee   :  { %v661_v11 = vpop.f32.mrf.mxu1  ;;  %1554 = vmatmul.mubr.bf16.gmra.mxu0 %v718_v6 }
 0x1ef   :  { %v662_v12 = vadd.f32 %v1888_v34, %v661_v11  ;;  %v704_v13 = vmax.f32 %v670_v9, 0.0  ;;  %v1928_v34 = vld [vmem:[%s2102_s6] ss:$0 sm:$0xff] }
 0x1f1   :  { %v702_v15 = vmax.f32 %v662_v12, 0.0  ;;  %v720_v18 = vpack.c.bf16 %v704_v13, %v703_v16 }
 0x1f3   :  { %v719_v17 = vpack.c.bf16 %v702_v15, %v701_v14 }
 0x1f5   :  { %1557 = vmatprep.mubr.bf16.mxu0 %v719_v17 }
 0x1f6   :  { %1558 = vmatmul.mubr.bf16.gmra.mxu0 %v720_v18 }
 0x27e   :  { %v1531_v20 = vpop.f32.mrf.mxu0 }
 0x27f   :  { %v835_v25 = vadd.f32 %v1531_v20, %v1928_v34 }
 0x280   :  { %v826_v21 = vpop.f32.mrf.mxu0 }
 0x281   :  { %v827_v23 = vadd.f32 %v1928_v34, %v826_v21  ;;  %v955_v31 = vmax.f32 %v835_v25, 0.0 }
 0x282   :  { %v1532_v22 = vpop.f32.mrf.mxu0 }
 0x283   :  { %v838_v24 = vadd.f32 %v1532_v22, %v1928_v34  ;;  %v953_v29 = vmax.f32 %v827_v23, 0.0 }
 0x284   :  { %v829_v26 = vpop.f32.mrf.mxu0 }
 0x285   :  { %v830_v41 = vadd.f32 %v1928_v34, %v829_v26  ;;  %v956_v27 = vmax.f32 %v838_v24, 0.0 }
 0x286   :  { %v1535_v28 = vpop.f32.mrf.mxu0 }
 0x287   :  { %v954_v30 = vmax.f32 %v830_v41, 0.0  ;;  %v986_v35 = vpack.c.bf16 %v956_v27, %v955_v31  ;;  %v851_v39 = vadd.f32 %v1535_v28, %v1928_v34 }
 0x288   :  { %v842_v32 = vpop.f32.mrf.mxu0 }
 0x289   :  { %v985_v33 = vpack.c.bf16 %v954_v30, %v953_v29  ;;  %v843_v37 = vadd.f32 %v1928_v34, %v842_v32  ;;  %v959_v47 = vmax.f32 %v851_v39, 0.0 }
 0x28a   :  { %v1536_v36 = vpop.f32.mrf.mxu0 }
 0x28b   :  { %v854_v38 = vadd.f32 %v1536_v36, %v1928_v34  ;;  %1577 = vmatprep.mubr.bf16.mxu1 %v985_v33  ;;  %v957_v45 = vmax.f32 %v843_v37, 0.0 }
 0x28c   :  { %v845_v40 = vpop.f32.mrf.mxu0  ;;  %1578 = vmatmul.mubr.bf16.vlgmr.msra.gmra.mxu1 %v986_v35 }
 0x28d   :  { %v846_v42 = vadd.f32 %v1928_v34, %v845_v40  ;;  %v960_v43 = vmax.f32 %v854_v38, 0.0 }
 0x28e   :  { %v1539_v44 = vpop.f32.mrf.mxu0 }
 0x28f   :  { %v958_v46 = vmax.f32 %v846_v42, 0.0  ;;  %v988_v50 = vpack.c.bf16 %v960_v43, %v959_v47  ;;  %v867_v54 = vadd.f32 %v1539_v44, %v1928_v34 }
 0x290   :  { %v858_v48 = vpop.f32.mrf.mxu0 }
 0x291   :  { %v987_v49 = vpack.c.bf16 %v958_v46, %v957_v45  ;;  %v859_v52 = vadd.f32 %v1928_v34, %v858_v48  ;;  %v963_v61 = vmax.f32 %v867_v54, 0.0 }
 0x292   :  { %v1540_v51 = vpop.f32.mrf.mxu0 }
 0x293   :  { %v870_v53 = vadd.f32 %v1540_v51, %v1928_v34  ;;  %1581 = vmatprep.mubr.bf16.mxu1 %v987_v49  ;;  %v961_v59 = vmax.f32 %v859_v52, 0.0 }
 0x294   :  { %v861_v55 = vpop.f32.mrf.mxu0  ;;  %1582 = vmatmul.mubr.bf16.gmra.mxu1 %v988_v50 }
 0x295   :  { %v862_v56 = vadd.f32 %v1928_v34, %v861_v55  ;;  %v964_v57 = vmax.f32 %v870_v53, 0.0 }
 0x296   :  { %v1543_v58 = vpop.f32.mrf.mxu0 }
 0x297   :  { %v962_v60 = vmax.f32 %v862_v56, 0.0  ;;  %v990_v0 = vpack.c.bf16 %v964_v57, %v963_v61  ;;  %v883_v4 = vadd.f32 %v1543_v58, %v1928_v34 }
 0x298   :  { %v874_v62 = vpop.f32.mrf.mxu0 }
 0x299   :  { %v989_v63 = vpack.c.bf16 %v962_v60, %v961_v59  ;;  %v875_v2 = vadd.f32 %v1928_v34, %v874_v62  ;;  %v967_v11 = vmax.f32 %v883_v4, 0.0 }
 0x29a   :  { %v1544_v1 = vpop.f32.mrf.mxu0 }
 0x29b   :  { %v886_v3 = vadd.f32 %v1544_v1, %v1928_v34  ;;  %1585 = vmatprep.mubr.bf16.mxu1 %v989_v63  ;;  %v965_v9 = vmax.f32 %v875_v2, 0.0 }
 0x29c   :  { %v877_v5 = vpop.f32.mrf.mxu0  ;;  %1586 = vmatmul.mubr.bf16.gmra.mxu1 %v990_v0 }
 0x29d   :  { %v878_v6 = vadd.f32 %v1928_v34, %v877_v5  ;;  %v968_v7 = vmax.f32 %v886_v3, 0.0 }
 0x29e   :  { %v1547_v8 = vpop.f32.mrf.mxu0 }
 0x29f   :  { %v966_v10 = vmax.f32 %v878_v6, 0.0  ;;  %v992_v14 = vpack.c.bf16 %v968_v7, %v967_v11  ;;  %v899_v18 = vadd.f32 %v1547_v8, %v1928_v34  ;;  %v1965_v6 = vld [vmem:[%s2103_s8] ss:$0 sm:$0xff] }
 0x2a0   :  { %v890_v12 = vpop.f32.mrf.mxu0 }
 0x2a1   :  { %v991_v13 = vpack.c.bf16 %v966_v10, %v965_v9  ;;  %v891_v16 = vadd.f32 %v1928_v34, %v890_v12  ;;  %v971_v25 = vmax.f32 %v899_v18, 0.0 }
 0x2a2   :  { %v1548_v15 = vpop.f32.mrf.mxu0 }
 0x2a3   :  { %v902_v17 = vadd.f32 %v1548_v15, %v1928_v34  ;;  %1589 = vmatprep.mubr.bf16.mxu1 %v991_v13  ;;  %v969_v23 = vmax.f32 %v891_v16, 0.0 }
 0x2a4   :  { %v893_v19 = vpop.f32.mrf.mxu0  ;;  %1590 = vmatmul.mubr.bf16.gmra.mxu1 %v992_v14 }
 0x2a5   :  { %v894_v20 = vadd.f32 %v1928_v34, %v893_v19  ;;  %v972_v21 = vmax.f32 %v902_v17, 0.0 }
 0x2a6   :  { %v1551_v22 = vpop.f32.mrf.mxu0 }
 0x2a7   :  { %v970_v24 = vmax.f32 %v894_v20, 0.0  ;;  %v994_v27 = vpack.c.bf16 %v972_v21, %v971_v25  ;;  %v915_v31 = vadd.f32 %v1551_v22, %v1928_v34 }
 0x2a8   :  { %v906_v26 = vpop.f32.mrf.mxu0 }
 0x2a9   :  { %v993_v41 = vpack.c.bf16 %v970_v24, %v969_v23  ;;  %v907_v29 = vadd.f32 %v1928_v34, %v906_v26  ;;  %v975_v39 = vmax.f32 %v915_v31, 0.0 }
 0x2aa   :  { %v1552_v28 = vpop.f32.mrf.mxu0 }
 0x2ab   :  { %v918_v30 = vadd.f32 %v1552_v28, %v1928_v34  ;;  %1593 = vmatprep.mubr.bf16.mxu1 %v993_v41  ;;  %v973_v37 = vmax.f32 %v907_v29, 0.0 }
 0x2ac   :  { %v909_v32 = vpop.f32.mrf.mxu0  ;;  %1594 = vmatmul.mubr.bf16.gmra.mxu1 %v994_v27 }
 0x2ad   :  { %v910_v33 = vadd.f32 %v1928_v34, %v909_v32  ;;  %v976_v35 = vmax.f32 %v918_v30, 0.0 }
 0x2ae   :  { %v1555_v36 = vpop.f32.mrf.mxu0 }
 0x2af   :  { %v974_v38 = vmax.f32 %v910_v33, 0.0  ;;  %v996_v43 = vpack.c.bf16 %v976_v35, %v975_v39  ;;  %v931_v47 = vadd.f32 %v1555_v36, %v1928_v34 }
 0x2b0   :  { %v922_v40 = vpop.f32.mrf.mxu0 }
 0x2b1   :  { %v995_v42 = vpack.c.bf16 %v974_v38, %v973_v37  ;;  %v923_v45 = vadd.f32 %v1928_v34, %v922_v40  ;;  %v979_v54 = vmax.f32 %v931_v47, 0.0 }
 0x2b2   :  { %v1556_v44 = vpop.f32.mrf.mxu0 }
 0x2b3   :  { %v934_v46 = vadd.f32 %v1556_v44, %v1928_v34  ;;  %1597 = vmatprep.mubr.bf16.mxu1 %v995_v42  ;;  %v977_v52 = vmax.f32 %v923_v45, 0.0 }
 0x2b4   :  { %v925_v48 = vpop.f32.mrf.mxu0  ;;  %1598 = vmatmul.mubr.bf16.gmra.mxu1 %v996_v43 }
 0x2b5   :  { %v926_v49 = vadd.f32 %v1928_v34, %v925_v48  ;;  %v980_v50 = vmax.f32 %v934_v46, 0.0 }
 0x2b6   :  { %v1559_v51 = vpop.f32.mrf.mxu0 }
 0x2b7   :  { %v978_v53 = vmax.f32 %v926_v49, 0.0  ;;  %v998_v57 = vpack.c.bf16 %v980_v50, %v979_v54  ;;  %v947_v61 = vadd.f32 %v1559_v51, %v1928_v34 }
 0x2b8   :  { %v938_v55 = vpop.f32.mrf.mxu0 }
 0x2b9   :  { %v997_v56 = vpack.c.bf16 %v978_v53, %v977_v52  ;;  %v939_v59 = vadd.f32 %v1928_v34, %v938_v55  ;;  %v983_v3 = vmax.f32 %v947_v61, 0.0 }
 0x2ba   :  { %v1560_v58 = vpop.f32.mrf.mxu0 }
 0x2bb   :  { %v950_v60 = vadd.f32 %v1560_v58, %v1928_v34  ;;  %1601 = vmatprep.mubr.bf16.mxu1 %v997_v56  ;;  %v981_v1 = vmax.f32 %v939_v59, 0.0 }
 0x2bc   :  { %v941_v62 = vpop.f32.mrf.mxu0  ;;  %1602 = vmatmul.mubr.bf16.gmra.mxu1 %v998_v57 }
 0x2bd   :  { %v942_v63 = vadd.f32 %v1928_v34, %v941_v62  ;;  %v984_v0 = vmax.f32 %v950_v60, 0.0 }
 0x2bf   :  { %v982_v2 = vmax.f32 %v942_v63, 0.0  ;;  %v1000_v5 = vpack.c.bf16 %v984_v0, %v983_v3 }
 0x2c1   :  { %v999_v4 = vpack.c.bf16 %v982_v2, %v981_v1 }
 0x2c3   :  { %1605 = vmatprep.mubr.bf16.mxu1 %v999_v4 }
 0x2c4   :  { %1606 = vmatmul.mubr.bf16.gmra.mxu1 %v1000_v5 }
 0x34c   :  { %v1579_v7 = vpop.f32.mrf.mxu1 }
 0x34d   :  { %v1115_v8 = vadd.f32 %v1579_v7, %v1965_v6 }
 0x34e   :  { %v1106_v9 = vpop.f32.mrf.mxu1 }
 0x34f   :  { %1235 = vst [vmem:[%s2104_s9 + $0x10] sm:$0xff] %v1115_v8  ;;  %v1107_v34 = vadd.f32 %v1965_v6, %v1106_v9 }
 0x350   :  { %v1580_v10 = vpop.f32.mrf.mxu1 }
 0x351   :  { %1233 = vst [vmem:[%s2104_s9] sm:$0xff] %v1107_v34  ;;  %v1118_v11 = vadd.f32 %v1580_v10, %v1965_v6 }
 0x352   :  { %v1109_v12 = vpop.f32.mrf.mxu1 }
 0x353   :  { %1236 = vst [vmem:[%s2104_s9 + $0x18] sm:$0xff] %v1118_v11  ;;  %v1110_v13 = vadd.f32 %v1965_v6, %v1109_v12 }
 0x354   :  { %v1583_v14 = vpop.f32.mrf.mxu1 }
 0x355   :  { %1234 = vst [vmem:[%s2104_s9 + $0x8] sm:$0xff] %v1110_v13  ;;  %v1131_v15 = vadd.f32 %v1583_v14, %v1965_v6 }
 0x356   :  { %v1122_v16 = vpop.f32.mrf.mxu1 }
 0x357   :  { %1239 = vst [vmem:[%s2104_s9 + $0x30] sm:$0xff] %v1131_v15  ;;  %v1123_v17 = vadd.f32 %v1965_v6, %v1122_v16 }
 0x358   :  { %v1584_v18 = vpop.f32.mrf.mxu1 }
 0x359   :  { %1237 = vst [vmem:[%s2104_s9 + $0x20] sm:$0xff] %v1123_v17  ;;  %v1134_v19 = vadd.f32 %v1584_v18, %v1965_v6 }
 0x35a   :  { %v1125_v20 = vpop.f32.mrf.mxu1 }
 0x35b   :  { %1240 = vst [vmem:[%s2104_s9 + $0x38] sm:$0xff] %v1134_v19  ;;  %v1126_v21 = vadd.f32 %v1965_v6, %v1125_v20 }
 0x35c   :  { %v1587_v22 = vpop.f32.mrf.mxu1 }
 0x35d   :  { %1238 = vst [vmem:[%s2104_s9 + $0x28] sm:$0xff] %v1126_v21  ;;  %v1147_v23 = vadd.f32 %v1587_v22, %v1965_v6 }
 0x35e   :  { %v1138_v24 = vpop.f32.mrf.mxu1 }
 0x35f   :  { %1243 = vst [vmem:[%s2104_s9 + $0x50] sm:$0xff] %v1147_v23  ;;  %v1139_v25 = vadd.f32 %v1965_v6, %v1138_v24 }
 0x360   :  { %v1588_v26 = vpop.f32.mrf.mxu1 }
 0x361   :  { %1241 = vst [vmem:[%s2104_s9 + $0x40] sm:$0xff] %v1139_v25  ;;  %v1150_v41 = vadd.f32 %v1588_v26, %v1965_v6 }
 0x362   :  { %v1141_v27 = vpop.f32.mrf.mxu1 }
 0x363   :  { %1244 = vst [vmem:[%s2104_s9 + $0x58] sm:$0xff] %v1150_v41  ;;  %v1142_v28 = vadd.f32 %v1965_v6, %v1141_v27 }
 0x364   :  { %v1591_v29 = vpop.f32.mrf.mxu1 }
 0x365   :  { %1242 = vst [vmem:[%s2104_s9 + $0x48] sm:$0xff] %v1142_v28  ;;  %v1163_v30 = vadd.f32 %v1591_v29, %v1965_v6 }
 0x366   :  { %v1154_v31 = vpop.f32.mrf.mxu1 }
 0x367   :  { %1247 = vst [vmem:[%s2104_s9 + $0x70] sm:$0xff] %v1163_v30  ;;  %v1155_v32 = vadd.f32 %v1965_v6, %v1154_v31 }
 0x368   :  { %v1592_v33 = vpop.f32.mrf.mxu1 }
 0x369   :  { %1245 = vst [vmem:[%s2104_s9 + $0x60] sm:$0xff] %v1155_v32  ;;  %v1166_v35 = vadd.f32 %v1592_v33, %v1965_v6 }
 0x36a   :  { %v1157_v36 = vpop.f32.mrf.mxu1 }
 0x36b   :  { %1248 = vst [vmem:[%s2104_s9 + $0x78] sm:$0xff] %v1166_v35  ;;  %v1158_v37 = vadd.f32 %v1965_v6, %v1157_v36 }
 0x36c   :  { %v1595_v38 = vpop.f32.mrf.mxu1 }
 0x36d   :  { %1246 = vst [vmem:[%s2104_s9 + $0x68] sm:$0xff] %v1158_v37  ;;  %v1179_v39 = vadd.f32 %v1595_v38, %v1965_v6 }
 0x36e   :  { %v1170_v40 = vpop.f32.mrf.mxu1 }
 0x36f   :  { %1251 = vst [vmem:[%s2104_s9 + $0x90] sm:$0xff] %v1179_v39  ;;  %v1171_v42 = vadd.f32 %v1965_v6, %v1170_v40 }
 0x370   :  { %v1596_v43 = vpop.f32.mrf.mxu1 }
 0x371   :  { %1249 = vst [vmem:[%s2104_s9 + $0x80] sm:$0xff] %v1171_v42  ;;  %v1182_v44 = vadd.f32 %v1596_v43, %v1965_v6 }
 0x372   :  { %v1173_v45 = vpop.f32.mrf.mxu1 }
 0x373   :  { %1252 = vst [vmem:[%s2104_s9 + $0x98] sm:$0xff] %v1182_v44  ;;  %v1174_v46 = vadd.f32 %v1965_v6, %v1173_v45 }
 0x374   :  { %v1599_v47 = vpop.f32.mrf.mxu1 }
 0x375   :  { %1250 = vst [vmem:[%s2104_s9 + $0x88] sm:$0xff] %v1174_v46  ;;  %v1195_v48 = vadd.f32 %v1599_v47, %v1965_v6 }
 0x376   :  { %v1186_v49 = vpop.f32.mrf.mxu1 }
 0x377   :  { %1255 = vst [vmem:[%s2104_s9 + $0xb0] sm:$0xff] %v1195_v48  ;;  %v1187_v50 = vadd.f32 %v1965_v6, %v1186_v49 }
 0x378   :  { %v1600_v51 = vpop.f32.mrf.mxu1 }
 0x379   :  { %1253 = vst [vmem:[%s2104_s9 + $0xa0] sm:$0xff] %v1187_v50  ;;  %v1198_v52 = vadd.f32 %v1600_v51, %v1965_v6 }
 0x37a   :  { %v1189_v53 = vpop.f32.mrf.mxu1 }
 0x37b   :  { %1256 = vst [vmem:[%s2104_s9 + $0xb8] sm:$0xff] %v1198_v52  ;;  %v1190_v54 = vadd.f32 %v1965_v6, %v1189_v53 }
 0x37c   :  { %v1603_v55 = vpop.f32.mrf.mxu1 }
 0x37d   :  { %1254 = vst [vmem:[%s2104_s9 + $0xa8] sm:$0xff] %v1190_v54  ;;  %v1211_v56 = vadd.f32 %v1603_v55, %v1965_v6 }
 0x37e   :  { %v1202_v57 = vpop.f32.mrf.mxu1 }
 0x37f   :  { %1259 = vst [vmem:[%s2104_s9 + $0xd0] sm:$0xff] %v1211_v56  ;;  %v1203_v58 = vadd.f32 %v1965_v6, %v1202_v57 }
 0x380   :  { %v1604_v59 = vpop.f32.mrf.mxu1 }
 0x381   :  { %1257 = vst [vmem:[%s2104_s9 + $0xc0] sm:$0xff] %v1203_v58  ;;  %v1214_v60 = vadd.f32 %v1604_v59, %v1965_v6 }
 0x382   :  { %v1205_v61 = vpop.f32.mrf.mxu1 }
 0x383   :  { %1260 = vst [vmem:[%s2104_s9 + $0xd8] sm:$0xff] %v1214_v60  ;;  %v1206_v62 = vadd.f32 %v1965_v6, %v1205_v61 }
 0x384   :  { %v1607_v63 = vpop.f32.mrf.mxu1 }
 0x385   :  { %1258 = vst [vmem:[%s2104_s9 + $0xc8] sm:$0xff] %v1206_v62  ;;  %v1227_v0 = vadd.f32 %v1607_v63, %v1965_v6 }
 0x386   :  { %v1218_v1 = vpop.f32.mrf.mxu1 }
 0x387   :  { %1263 = vst [vmem:[%s2104_s9 + $0xf0] sm:$0xff] %v1227_v0  ;;  %v1219_v2 = vadd.f32 %v1965_v6, %v1218_v1 }
 0x388   :  { %v1608_v3 = vpop.f32.mrf.mxu1 }
 0x389   :  { %1261 = vst [vmem:[%s2104_s9 + $0xe0] sm:$0xff] %v1219_v2  ;;  %v1230_v4 = vadd.f32 %v1608_v3, %v1965_v6 }
 0x38a   :  { %v1221_v5 = vpop.f32.mrf.mxu1 }
 0x38b   :  { %1264 = vst [vmem:[%s2104_s9 + $0xf8] sm:$0xff] %v1230_v4  ;;  %v1222_v7 = vadd.f32 %v1965_v6, %v1221_v5 }
 0x38d   :  { %1262 = vst [vmem:[%s2104_s9 + $0xe8] sm:$0xff] %v1222_v7 }

</bundles_post_ra>
